<compile_context>
chip_gen: v6e
topology: v6e:2x2x1
jax: 0.10.0
libtpu: 0.0.40
codegen_flags: <defaults>
</compile_context>

<pallas_src>
import numpy as np
import jax
import jax.numpy as jnp
from jax.experimental import pallas as pl
from jax.experimental.pallas import tpu as pltpu

D_IN, D_H1, D_H2, D_OUT = 10, 256, 128, 100
D_OUT_PAD = 128  # lane-dense output width (padded from 100)
SUB_ROWS = 512   # in-kernel M sub-tile (bounds h1/h2 VMEM intermediates)


def _round_up(n, m):
    return ((n + m - 1) // m) * m


def _chip_defaults():
    """Best-effort generation-aware defaults; conservative fallback if unknown."""
    kind = ""
    try:
        kind = jax.devices()[0].device_kind.lower()
    except Exception:
        pass
    if "v7" in kind:
        # 2 TensorCores/chip, 64 MiB physical VMEM -> explicit budget + 2-way split.
        return dict(batch_tile=4096, vmem_limit=48 * 1024 * 1024, split_two=True)
    if "v6" in kind:
        return dict(batch_tile=4096, vmem_limit=64 * 1024 * 1024, split_two=False)
    # v5e / unknown: stay modest (v5e scoped-VMEM default is 16 MiB; raise a bit).
    return dict(batch_tile=2048, vmem_limit=32 * 1024 * 1024, split_two=False)


def prepare_params(w1, b1, w2, b2, w3, b3, *, use_bf16=True):
    """One-time parameter prep (do at model-load time, NOT per forward call):
    pad the last layer 100 -> 128 lanes and cast weights to the matmul dtype.
    Biases stay f32 (added after the f32-accumulated matmul)."""
    mm_dt = jnp.bfloat16 if use_bf16 else jnp.float32
    b1 = jnp.asarray(b1, jnp.float32).reshape(1, -1)
    b2 = jnp.asarray(b2, jnp.float32).reshape(1, -1)
    b3 = jnp.asarray(b3, jnp.float32).reshape(1, -1)
    w3p = jnp.pad(w3, ((0, 0), (0, D_OUT_PAD - D_OUT)))
    b3p = jnp.pad(b3, ((0, 0), (0, D_OUT_PAD - D_OUT)))
    return (w1.astype(mm_dt), b1, w2.astype(mm_dt), b2, w3p.astype(mm_dt), b3p)


def _make_kernel(sub_rows, n_sub, precision):
    def kernel(x_ref, w1_ref, b1_ref, w2_ref, b2_ref, w3_ref, b3_ref, o_ref):
        w_dt = w1_ref.dtype
        w1, b1 = w1_ref[...], b1_ref[...]
        w2, b2 = w2_ref[...], b2_ref[...]
        w3, b3 = w3_ref[...], b3_ref[...]

        def compute(r0):
            # In-kernel cast of the f32 x tile to the matmul dtype (no wrapper cast).
            x = x_ref[pl.ds(r0, sub_rows), :].astype(w_dt)
            h1 = jnp.dot(x, w1, preferred_element_type=jnp.float32,
                         precision=precision) + b1
            h1 = jnp.maximum(h1, 0.0)
            h2 = jnp.dot(h1.astype(w_dt), w2, preferred_element_type=jnp.float32,
                         precision=precision) + b2
            h2 = jnp.maximum(h2, 0.0)
            o = jnp.dot(h2.astype(w_dt), w3, preferred_element_type=jnp.float32,
                        precision=precision) + b3
            o_ref[pl.ds(r0, sub_rows), :] = o.astype(o_ref.dtype)

        if n_sub == 1:
            compute(0)
        else:
            def body(s, carry):
                compute(pl.multiple_of(s * sub_rows, sub_rows))
                return carry
            jax.lax.fori_loop(0, n_sub, body, 0, unroll=False)

    return kernel


def fc_input_model(x, params, *, batch_tile=None, out_dtype=jnp.bfloat16,
                   vmem_limit_bytes=None, split_two=None, trim=False):
    """Forward pass of FCInputModel.

    x: [B, 10] f32. `params` must come from prepare_params().
    Returns the padded [B_pad, 128] buffer in `out_dtype` (rows >= B and columns
    100..127 are meaningless) unless trim=True, which slices back to [B, 100].
    """
    assert x.ndim == 2 and x.shape[1] == D_IN
    w1, b1, w2, b2, w3, b3 = params
    B = x.shape[0]

    d = _chip_defaults()
    batch_tile = d["batch_tile"] if batch_tile is None else batch_tile
    vmem_limit_bytes = d["vmem_limit"] if vmem_limit_bytes is None else vmem_limit_bytes
    split_two = d["split_two"] if split_two is None else split_two

    align = 16  # sublane alignment covering bf16-packed tiles; free for f32 too
    bt = min(batch_tile, _round_up(B, align))
    # Only force a >=2-step grid on v7x (2 TensorCores); pure overhead elsewhere.
    if split_two and _round_up(B, align) <= batch_tile and B > 2 * align:
        bt = max(align, _round_up(-(-B // 2), align))
    B_pad = _round_up(B, bt)
    if B_pad != B:
        x = jnp.pad(x, ((0, B_pad - B), (0, 0)))

    # In-kernel M sub-tiling bounds h1/h2 intermediates for large batch tiles.
    if bt > SUB_ROWS and bt % SUB_ROWS == 0:
        sub_rows, n_sub = SUB_ROWS, bt // SUB_ROWS
    else:
        sub_rows, n_sub = bt, 1

    # f32-weight path gets HIGHEST precision (true f32 MXU matmul) for parity.
    precision = jax.lax.Precision.HIGHEST if w1.dtype == jnp.float32 else None

    grid = (B_pad // bt,)
    # Constant index maps -> weights/biases stay VMEM-resident across grid steps.
    full = lambda shape: pl.BlockSpec(shape, lambda i: (0,) * len(shape))

    out = pl.pallas_call(
        _make_kernel(sub_rows, n_sub, precision),
        out_shape=jax.ShapeDtypeStruct((B_pad, D_OUT_PAD), out_dtype),
        grid_spec=pltpu.PrefetchScalarGridSpec(
            num_scalar_prefetch=0,
            grid=grid,
            in_specs=[
                pl.BlockSpec((bt, D_IN), lambda i: (i, 0)),
                full((D_IN, D_H1)),
                full((1, D_H1)),
                full((D_H1, D_H2)),
                full((1, D_H2)),
                full((D_H2, D_OUT_PAD)),
                full((1, D_OUT_PAD)),
            ],
            out_specs=pl.BlockSpec((bt, D_OUT_PAD), lambda i: (i, 0)),
        ),
        compiler_params=pltpu.CompilerParams(
            dimension_semantics=("parallel",),
            vmem_limit_bytes=int(vmem_limit_bytes),
        ),
    )(x, w1, b1, w2, b2, w3, b3)

    if trim:
        out = out[:B, :D_OUT]
    return out


def _init_params(key):
    # Deterministic synthetic init (uniform, roughly matching nn.Linear's scale).
    ks = jax.random.split(key, 6)

    def lin(kw, kb, fan_in, fan_out):
        bound = 1.0 / np.sqrt(fan_in)
        w = jax.random.uniform(kw, (fan_in, fan_out), jnp.float32, -bound, bound)
        b = jax.random.uniform(kb, (1, fan_out), jnp.float32, -bound, bound)
        return w, b

    w1, b1 = lin(ks[0], ks[1], D_IN, D_H1)
    w2, b2 = lin(ks[2], ks[3], D_H1, D_H2)
    w3, b3 = lin(ks[4], ks[5], D_H2, D_OUT)
    return w1, b1, w2, b2, w3, b3


def _reference(x, w1, b1, w2, b2, w3, b3):
    h1 = jnp.maximum(x @ w1 + b1, 0.0)
    h2 = jnp.maximum(h1 @ w2 + b2, 0.0)
    return h2 @ w3 + b3


if __name__ == "__main__":
    key = jax.random.PRNGKey(0)
    k_x, k_p, k_x2 = jax.random.split(key, 3)

    B = 12  # small, deliberately not sublane-aligned to exercise batch pad
    x = jax.random.normal(k_x, (B, D_IN), dtype=jnp.float32)
    raw = _init_params(k_p)
    ref = jax.block_until_ready(_reference(x, *raw))

    # --- f32-weight / f32-output path (tight tolerance) ---
    p_f32 = prepare_params(*raw, use_bf16=False)
    out_f32 = jax.block_until_ready(
        fc_input_model(x, p_f32, out_dtype=jnp.float32, trim=True))
    assert out_f32.shape == (B, D_OUT)
    assert np.allclose(np.asarray(out_f32), np.asarray(ref), atol=1e-4, rtol=1e-4)

    # --- default fast path: bf16 weights + bf16 output, padded buffer returned ---
    p_bf16 = prepare_params(*raw, use_bf16=True)
    out_bf16 = jax.block_until_ready(fc_input_model(x, p_bf16))
    assert out_bf16.shape[1] == D_OUT_PAD and out_bf16.dtype == jnp.bfloat16
    got = np.asarray(out_bf16[:B, :D_OUT]).astype(np.float32)  # caller-side lazy slice
    assert np.allclose(got, np.asarray(ref), atol=6e-2, rtol=6e-2)

    # --- multi-grid-step + in-kernel 512-row sub-tile path (modest batch) ---
    B2 = 1100
    x2 = jax.random.normal(k_x2, (B2, D_IN), dtype=jnp.float32)
    ref2 = jax.block_until_ready(_reference(x2, *raw))
    out2 = jax.block_until_ready(
        fc_input_model(x2, p_f32, out_dtype=jnp.float32, batch_tile=1024,
                       split_two=False, trim=True))
    assert out2.shape == (B2, D_OUT)
    assert np.allclose(np.asarray(out2), np.asarray(ref2), atol=1e-4, rtol=1e-4)

    print("KERNEL_OK")
</pallas_src>

<mosaic_0001>
module attributes {stable_mosaic.version = 11 : i64} {
  func.func @kernel(%arg0: i32, %arg1: memref<16x10xf32, #tpu.memory_space<vmem>>, %arg2: memref<10x256xf32, #tpu.memory_space<vmem>>, %arg3: memref<1x256xf32, #tpu.memory_space<vmem>>, %arg4: memref<256x128xf32, #tpu.memory_space<vmem>>, %arg5: memref<1x128xf32, #tpu.memory_space<vmem>>, %arg6: memref<128x128xf32, #tpu.memory_space<vmem>>, %arg7: memref<1x128xf32, #tpu.memory_space<vmem>>, %arg8: memref<16x128xf32, #tpu.memory_space<vmem>>) attributes {dimension_semantics = [#tpu.dimension_semantics<parallel>], iteration_bounds = array<i64: 1>, scalar_prefetch = 0 : i64, scratch_operands = 0 : i64, tpu.core_type = #tpu.core_type<tc>, window_params = [{transform_indices = @transform_0, window_bounds = array<i64: 16, 10>}, {pipeline_mode = #tpu.pipeline_mode<synchronous>, transform_indices = @transform_1, window_bounds = array<i64: 10, 256>}, {pipeline_mode = #tpu.pipeline_mode<synchronous>, transform_indices = @transform_2, window_bounds = array<i64: 1, 256>}, {pipeline_mode = #tpu.pipeline_mode<synchronous>, transform_indices = @transform_3, window_bounds = array<i64: 256, 128>}, {pipeline_mode = #tpu.pipeline_mode<synchronous>, transform_indices = @transform_4, window_bounds = array<i64: 1, 128>}, {pipeline_mode = #tpu.pipeline_mode<synchronous>, transform_indices = @transform_5, window_bounds = array<i64: 128, 128>}, {pipeline_mode = #tpu.pipeline_mode<synchronous>, transform_indices = @transform_6, window_bounds = array<i64: 1, 128>}, {transform_indices = @transform_7, window_bounds = array<i64: 16, 128>}]} {
    %c0 = arith.constant 0 : index
    %c0_0 = arith.constant 0 : index
    %0 = vector.load %arg2[%c0, %c0_0] : memref<10x256xf32, #tpu.memory_space<vmem>>, vector<10x256xf32>
    %c0_1 = arith.constant 0 : index
    %c0_2 = arith.constant 0 : index
    %1 = vector.load %arg3[%c0_1, %c0_2] : memref<1x256xf32, #tpu.memory_space<vmem>>, vector<1x256xf32>
    %c0_3 = arith.constant 0 : index
    %c0_4 = arith.constant 0 : index
    %2 = vector.load %arg4[%c0_3, %c0_4] : memref<256x128xf32, #tpu.memory_space<vmem>>, vector<256x128xf32>
    %c0_5 = arith.constant 0 : index
    %c0_6 = arith.constant 0 : index
    %3 = vector.load %arg5[%c0_5, %c0_6] : memref<1x128xf32, #tpu.memory_space<vmem>>, vector<1x128xf32>
    %c0_7 = arith.constant 0 : index
    %c0_8 = arith.constant 0 : index
    %4 = vector.load %arg6[%c0_7, %c0_8] : memref<128x128xf32, #tpu.memory_space<vmem>>, vector<128x128xf32>
    %c0_9 = arith.constant 0 : index
    %c0_10 = arith.constant 0 : index
    %5 = vector.load %arg7[%c0_9, %c0_10] : memref<1x128xf32, #tpu.memory_space<vmem>>, vector<1x128xf32>
    %c0_11 = arith.constant 0 : index
    %c0_12 = arith.constant 0 : index
    %6 = vector.load %arg1[%c0_11, %c0_12] : memref<16x10xf32, #tpu.memory_space<vmem>>, vector<16x10xf32>
    %cst = arith.constant dense<0.000000e+00> : vector<16x256xf32>
    %7 = tpu.matmul %6, %0, %cst {dimension_numbers = #tpu.dot_dimension_numbers<[1], [0], [0], [1], [0, 0, 1, 1], [], []>, precision = #tpu.contract_precision<fp32>} : vector<16x10xf32>, vector<10x256xf32>, vector<16x256xf32> -> vector<16x256xf32>
    %8 = vector.broadcast %1 : vector<1x256xf32> to vector<16x256xf32>
    %9 = arith.addf %7, %8 : vector<16x256xf32>
    %cst_13 = arith.constant 0.000000e+00 : f32
    %10 = vector.broadcast %cst_13 : f32 to vector<16x256xf32>
    %11 = arith.maximumf %9, %10 : vector<16x256xf32>
    %cst_14 = arith.constant dense<0.000000e+00> : vector<16x128xf32>
    %12 = tpu.matmul %11, %2, %cst_14 {dimension_numbers = #tpu.dot_dimension_numbers<[1], [0], [0], [1], [0, 0, 1, 1], [], []>, precision = #tpu.contract_precision<fp32>} : vector<16x256xf32>, vector<256x128xf32>, vector<16x128xf32> -> vector<16x128xf32>
    %13 = vector.broadcast %3 : vector<1x128xf32> to vector<16x128xf32>
    %14 = arith.addf %12, %13 : vector<16x128xf32>
    %cst_15 = arith.constant 0.000000e+00 : f32
    %15 = vector.broadcast %cst_15 : f32 to vector<16x128xf32>
    %16 = arith.maximumf %14, %15 : vector<16x128xf32>
    %cst_16 = arith.constant dense<0.000000e+00> : vector<16x128xf32>
    %17 = tpu.matmul %16, %4, %cst_16 {dimension_numbers = #tpu.dot_dimension_numbers<[1], [0], [0], [1], [0, 0, 1, 1], [], []>, precision = #tpu.contract_precision<fp32>} : vector<16x128xf32>, vector<128x128xf32>, vector<16x128xf32> -> vector<16x128xf32>
    %18 = vector.broadcast %5 : vector<1x128xf32> to vector<16x128xf32>
    %19 = arith.addf %17, %18 : vector<16x128xf32>
    %c0_17 = arith.constant 0 : index
    %c0_18 = arith.constant 0 : index
    %20 = vector.load %arg8[%c0_17, %c0_18] : memref<16x128xf32, #tpu.memory_space<vmem>>, vector<16x128xf32>
    tpu.vector_store %arg8[%c0_17, %c0_18], %19 {strides = array<i32>} : memref<16x128xf32, #tpu.memory_space<vmem>>, vector<16x128xf32>,
    return
  }
  func.func @transform_0(%arg0: i32) -> (i32, i32) {
    %c0_i32 = arith.constant 0 : i32
    %c0_i32_0 = arith.constant 0 : i32
    return %arg0, %c0_i32 : i32, i32
  }
  func.func @transform_1(%arg0: i32) -> (i32, i32) {
    %c0_i32 = arith.constant 0 : i32
    %c0_i32_0 = arith.constant 0 : i32
    %c0_i32_1 = arith.constant 0 : i32
    return %c0_i32, %c0_i32_0 : i32, i32
  }
  func.func @transform_2(%arg0: i32) -> (i32, i32) {
    %c0_i32 = arith.constant 0 : i32
    %c0_i32_0 = arith.constant 0 : i32
    %c0_i32_1 = arith.constant 0 : i32
    return %c0_i32, %c0_i32_0 : i32, i32
  }
  func.func @transform_3(%arg0: i32) -> (i32, i32) {
    %c0_i32 = arith.constant 0 : i32
    %c0_i32_0 = arith.constant 0 : i32
    %c0_i32_1 = arith.constant 0 : i32
    return %c0_i32, %c0_i32_0 : i32, i32
  }
  func.func @transform_4(%arg0: i32) -> (i32, i32) {
    %c0_i32 = arith.constant 0 : i32
    %c0_i32_0 = arith.constant 0 : i32
    %c0_i32_1 = arith.constant 0 : i32
    return %c0_i32, %c0_i32_0 : i32, i32
  }
  func.func @transform_5(%arg0: i32) -> (i32, i32) {
    %c0_i32 = arith.constant 0 : i32
    %c0_i32_0 = arith.constant 0 : i32
    %c0_i32_1 = arith.constant 0 : i32
    return %c0_i32, %c0_i32_0 : i32, i32
  }
  func.func @transform_6(%arg0: i32) -> (i32, i32) {
    %c0_i32 = arith.constant 0 : i32
    %c0_i32_0 = arith.constant 0 : i32
    %c0_i32_1 = arith.constant 0 : i32
    return %c0_i32, %c0_i32_0 : i32, i32
  }
  func.func @transform_7(%arg0: i32) -> (i32, i32) {
    %c0_i32 = arith.constant 0 : i32
    %c0_i32_0 = arith.constant 0 : i32
    return %arg0, %c0_i32 : i32, i32
  }
}

</mosaic_0001>

<bundles_post_ra>
// kernel: tpu_custom_call.1
= control target key start
LH: loop header
LB: loop body
LE: loop exit
PB: predicated region body
PF: predicated region fallthrough
CT: control target
= control target key end

     0   :  { %12 = vsyncpa [#allocation3], 0  ;;  %s4030_s0 = inlined_call_operand.hbm [shape: f32[16,10], index: 0, kind: input, shape index: {}]   ;;  %s4031_s1 = inlined_call_operand.hbm [shape: f32[10,256], index: 1, kind: input, shape index: {}]   ;;  %s4032_s2 = inlined_call_operand.vmem [shape: f32[1,256], index: 2, kind: input, shape index: {}]   ;;  %s4033_s3 = inlined_call_operand.hbm [shape: f32[256,128], index: 3, kind: input, shape index: {}]   ;;  %s4034_s4 = inlined_call_operand.vmem [shape: f32[1,128], index: 4, kind: input, shape index: {}]   ;;  %s4035_s5 = inlined_call_operand.hbm [shape: f32[128,128], index: 5, kind: input, shape index: {}]   ;;  %s4036_s6 = inlined_call_operand.vmem [shape: f32[1,128], index: 6, kind: input, shape index: {}]   ;;  %s4037_s7 = inlined_call_operand.hbm [shape: f32[16,128], index: 7, kind: output, shape index: {}]  }
   0x1   :  { %13 = vsyncpa [#allocation6], 0 }
   0x2   :  { %14 = vsyncpa [#allocation9], 0 }
   0x3   :  { %15 = vsyncpa [#allocation4], 0  ;;  %s3011_s24 = smov [#allocation5]  }
   0x4   :  { %s33_s25 = sshll.u32 %s3011_s24, 4  ;;  %s34_s25 = int_to_ptr.vmem [resolvable:$true] %s33_s25 }
   0x5   :  { %s2911_s26 = scalar_lea.vmem %s34_s25, 512  ;;  %p2916_p1 = scmp.lt.s32.totalorder %s34_s25, %s34_s25 }
   0x6   :  { %p2912_p0 = scmp.ne.s32.totalorder %s34_s25, %s2911_s26  ;;  %p2917_p2 = scmp.lt.s32.totalorder %s2911_s26, %s2911_s26 }
   0x8   :  { %p2918_p3 = por %p2917_p2, %p2916_p1 }
   0xa   :  { %p2919_p4 = pnand %p2918_p3, %p2912_p0 }
   0xc   :  { %2922 = shalt.err (!%p2919_p4)
}
   0xd   :  { %s3012_s27 = smov 256   ;;  %s3013_s28 = smov 16  }
   0xe   :  { %39 = dma.hbm_to_vmem [thread:$0]  %s4031_s1, 512, %s34_s25, [#allocation6], %s3012_s27, %s3012_s27, %s3013_s28  }
   0xf   :  { %s3014_s8 = smov [#allocation2]  }
  0x10   :  { %s21_s9 = sshll.u32 %s3014_s8, 4  ;;  %s22_s9 = int_to_ptr.vmem [resolvable:$true] %s21_s9 }
  0x11   :  { %s2931_s10 = scalar_lea.vmem %s22_s9, 256  ;;  %p2936_p6 = scmp.lt.s32.totalorder %s22_s9, %s22_s9 }
  0x12   :  { %p2932_p5 = scmp.ne.s32.totalorder %s22_s9, %s2931_s10  ;;  %p2937_p7 = scmp.lt.s32.totalorder %s2931_s10, %s2931_s10 }
  0x14   :  { %p2938_p8 = por %p2937_p7, %p2936_p6 }
  0x16   :  { %p2939_p9 = pnand %p2938_p8, %p2932_p5 }
  0x18   :  { %2942 = shalt.err (!%p2939_p9)
}
  0x19   :  { %s3015_s11 = smov 128   ;;  %s3016_s12 = smov 8  }
  0x1a   :  { %27 = dma.hbm_to_vmem [thread:$0]  %s4030_s0, 256, %s22_s9, [#allocation3], %s3015_s11, %s3015_s11, %s3016_s12  }
  0x1b   :  { %s3017_s1 = smov [#allocation7]   ;;  %s3018_s16 = smov [#allocation8]  }
  0x1c   :  { %s47_s15 = sshll.u32 %s3017_s1, 4  ;;  %s61_s17 = sshll.u32 %s3018_s16, 4  ;;  %s48_s15 = int_to_ptr.vmem [resolvable:$true] %s47_s15  ;;  %s62_s17 = int_to_ptr.vmem [resolvable:$true] %s61_s17 }
  0x1d   :  { %s2951_s18 = scalar_lea.vmem %s48_s15, 4096  ;;  %p2956_p11 = scmp.lt.s32.totalorder %s48_s15, %s48_s15 }
  0x1e   :  { %p2952_p10 = scmp.ne.s32.totalorder %s48_s15, %s2951_s18  ;;  %p2957_p12 = scmp.lt.s32.totalorder %s2951_s18, %s2951_s18 }
  0x20   :  { %p2958_p13 = por %p2957_p12, %p2956_p11 }
  0x22   :  { %p2959_p0 = pnand %p2958_p13, %p2952_p10 }
  0x24   :  { %2962 = shalt.err (!%p2959_p0)
}
  0x25   :  { %53 = dma.hbm_to_vmem [thread:$0]  %s4033_s3, 4096, %s48_s15, [#allocation6], %s3015_s11, %s3015_s11, %s3016_s12  }
  0x26   :  { %s2971_s0 = scalar_lea.vmem %s62_s17, 2048  ;;  %p2976_p2 = scmp.lt.s32.totalorder %s62_s17, %s62_s17 }
  0x27   :  { %p2972_p1 = scmp.ne.s32.totalorder %s62_s17, %s2971_s0  ;;  %p2977_p3 = scmp.lt.s32.totalorder %s2971_s0, %s2971_s0 }
  0x29   :  { %p2978_p4 = por %p2977_p3, %p2976_p2 }
  0x2b   :  { %p2979_p5 = pnand %p2978_p4, %p2972_p1 }
  0x2d   :  { %2982 = shalt.err (!%p2979_p5)
}
  0x2e   :  { %67 = dma.hbm_to_vmem [thread:$0]  %s4035_s5, 2048, %s62_s17, [#allocation9], %s3015_s11, %s3015_s11, %s3016_s12  }
  0x2f   :  { %3003 = dma.done.wait [#allocation3], 256  }
  0x30   :  { %3004 = vsyncadd [#allocation3], 4294967040 }
  0x31   :  { %3005 = dma.done.wait [#allocation6], 4608  }
  0x32   :  { %3006 = vsyncadd [#allocation6], 4294962688 }
  0x33   :  { %3007 = dma.done.wait [#allocation9], 2048  }
  0x34   :  { %3008 = vsyncadd [#allocation9], 4294965248  ;;  %v3019_v0 = vmov 0.0   ;;  %vm157_vm0 = vcmask 1041408   ;;  %vm150_vm1 = vcmask 80896   ;;  %v83_v3 = vld [vmem:[#allocation5 + $0x8] sm:$0xff] }
  0x35   :  { %232 = vmatprep.mubr.f32.mxu0 %v3019_v0  ;;  %339 = vmatprep.mubr.f32.mxu1 %v3019_v0  ;;  %v85_v1 = vld [vmem:[#allocation5 + $0x18] sm:$0x3]  ;;  %v84_v2 = vld [vmem:[#allocation5 + $0x10] sm:$0x3]  ;;  %v3084_v6 = vand.u32 4294901760, %v83_v3  ;;  %v82_v7 = vld [vmem:[#allocation5] sm:$0xff] }
  0x36   :  { %v162_v4 = vsel %vm157_vm0, %v85_v1, 0  ;;  %v159_v5 = vsel %vm157_vm0, %v84_v2, 0  ;;  %v137_v8 = vld [vmem:[#allocation2] sm:$0xff]  ;;  %v138_v9 = vld [vmem:[#allocation2 + $0x8] sm:$0xff]  ;;  %v3090_v12 = vand.u32 4294901760, %v82_v7  ;;  %v116_v61 = vld [vmem:[#allocation7 + $0xe8] sm:$0xff] }
  0x37   :  { %v3086_v10 = vand.u32 4294901760, %v162_v4  ;;  %v3088_v11 = vand.u32 4294901760, %v159_v5  ;;  %v152_v13 = vsel %vm150_vm1, %v137_v8, 0  ;;  %v3096_v15 = vsub.f32 %v83_v3, %v3084_v6  ;;  %v118_v33 = vld [vmem:[#allocation7 + $0xf8] sm:$0xff]  ;;  %v117_v43 = vld [vmem:[#allocation7 + $0xf0] sm:$0xff]  ;;  %v100_v63 = vld [vmem:[#allocation7 + $0x68] sm:$0xff] }
  0x38   :  { %v3093_v14 = vand.u32 4294901760, %v152_v13  ;;  %v155_v16 = vsel %vm150_vm1, %v138_v9, 0  ;;  %v3103_v19 = vsub.f32 %v82_v7, %v3090_v12  ;;  %v3120_v41 = vand.u32 4294901760, %v118_v33  ;;  %v102_v42 = vld [vmem:[#allocation7 + $0x78] sm:$0xff]  ;;  %v101_v59 = vld [vmem:[#allocation7 + $0x70] sm:$0xff]  ;;  %v115_v3 = vld [vmem:[#allocation7 + $0xe0] sm:$0xff] }
  0x39   :  { %193 = vmatprep.subr.mxu0 %v3086_v10  ;;  %v284_v17 = vsub.f32 %v162_v4, %v3086_v10  ;;  %v290_v18 = vsub.f32 %v159_v5, %v3088_v11  ;;  %v3105_v20 = vand.u32 4294901760, %v155_v16  ;;  %v297_v22 = vand.u32 4294901760, %v3096_v15  ;;  %v99_v5 = vld [vmem:[#allocation7 + $0x60] sm:$0xff]  ;;  %v114_v9 = vld [vmem:[#allocation7 + $0xd8] sm:$0xff] }
  0x3a   :  { %195 = vmatpush1.msra.mxu0 %v3088_v11  ;;  %v234_v21 = vsub.f32 %v152_v13, %v3093_v14  ;;  %v303_v25 = vand.u32 4294901760, %v3103_v19  ;;  %4177 = vst [vmem:[#allocation15_spill] sm:$0xff] %v3120_v41  ;;  %v3123_v45 = vand.u32 4294901760, %v102_v42  ;;  %v3126_v46 = vsub.f32 %v118_v33, %v3120_v41  ;;  %v98_v13 = vld [vmem:[#allocation7 + $0x58] sm:$0xff] }
  0x3b   :  { %197 = vmatprep.subr.mxu0 %v3084_v6  ;;  %v285_v23 = vand.u32 4294901760, %v284_v17  ;;  %v291_v24 = vand.u32 4294901760, %v290_v18  ;;  %v3113_v26 = vsub.f32 %v155_v16, %v3105_v20  ;;  %v298_v28 = vsub.f32 %v3096_v15, %v297_v22 }
  0x3c   :  { %199 = vmatpush1.msra.mxu0 %v3090_v12  ;;  %v235_v27 = vand.u32 4294901760, %v234_v21  ;;  %v304_v31 = vsub.f32 %v3103_v19, %v303_v25  ;;  %4178 = vst [vmem:[#allocation16_spill] sm:$0xff] %v3126_v46  ;;  %v3128_v47 = vand.u32 4294901760, %v117_v43  ;;  %v3136_v48 = vsub.f32 %v102_v42, %v3123_v45  ;;  %v95_v42 = vld [vmem:[#allocation7 + $0x40] sm:$0xff] }
  0x3d   :  { %v286_v29 = vsub.f32 %v284_v17, %v285_v23  ;;  %v292_v30 = vsub.f32 %v290_v18, %v291_v24  ;;  %384 = vmatprep.subr.mxu0 %v284_v17  ;;  %v246_v32 = vand.u32 4294901760, %v3113_v26  ;;  %v299_v37 = vand.u32 4294901760, %v298_v28 }
  0x3e   :  { %v236_v34 = vsub.f32 %v234_v21, %v235_v27  ;;  %v305_v40 = vand.u32 4294901760, %v304_v31  ;;  %v4057_v49 = vand.u32 4294901760, %v3126_v46  ;;  %v3142_v50 = vsub.f32 %v117_v43, %v3128_v47  ;;  %v112_v31 = vld [vmem:[#allocation7 + $0xc8] sm:$0xff] }
  0x3f   :  { %v287_v35 = vand.u32 4294901760, %v286_v29  ;;  %v293_v36 = vand.u32 4294901760, %v292_v30  ;;  %v247_v38 = vsub.f32 %v3113_v26, %v246_v32  ;;  %v4055_v51 = vand.u32 4294901760, %v3136_v48 }
  0x40   :  { %v237_v39 = vand.u32 4294901760, %v236_v34  ;;  %v957_v52 = vsub.f32 %v3126_v46, %v4057_v49  ;;  %v4054_v53 = vand.u32 4294901760, %v3142_v50  ;;  %v3177_v60 = vand.u32 4294901760, %v101_v59  ;;  %v89_v49 = vld [vmem:[#allocation7 + $0x10] sm:$0xff] }
  0x41   :  { %288 = vmatprep.subr.mxu1 %v287_v35  ;;  %v248_v44 = vand.u32 4294901760, %v247_v38  ;;  %v845_v54 = vsub.f32 %v3136_v48, %v4055_v51  ;;  %v3179_v62 = vand.u32 4294901760, %v116_v61  ;;  %v3184_v2 = vand.u32 4294901760, %v100_v63 }
  0x42   :  { %238 = vmatmul.mubr.f32.vlgmr.msra.gmra.mxu0 %v237_v39  ;;  %294 = vmatpush1.msra.mxu1 %v293_v36  ;;  %v958_v55 = vand.u32 4294901760, %v957_v52  ;;  %v964_v56 = vsub.f32 %v3142_v50, %v4054_v53  ;;  %v3182_v1 = vsub.f32 %v101_v59, %v3177_v60  ;;  %v3190_v4 = vand.u32 4294901760, %v115_v3  ;;  %v96_v36 = vld [vmem:[#allocation7 + $0x48] sm:$0xff] }
  0x43   :  { %300 = vmatprep.subr.mxu1 %v299_v37  ;;  %243 = vmatprep.mubr.f32.mxu0 %v3019_v0  ;;  %v846_v57 = vand.u32 4294901760, %v845_v54  ;;  %v3195_v7 = vsub.f32 %v100_v63, %v3184_v2  ;;  %v3197_v8 = vand.u32 4294901760, %v99_v5  ;;  %v3214_v17 = vand.u32 4294901760, %v98_v13  ;;  %v111_v37 = vld [vmem:[#allocation7 + $0xc0] sm:$0xff] }
  0x44   :  { %306 = vmatpush1.msra.mxu1 %v305_v40  ;;  %387 = vmatpush1.msra.mxu0 %v290_v18  ;;  %v965_v58 = vand.u32 4294901760, %v964_v56  ;;  %v113_v18 = vld [vmem:[#allocation7 + $0xd0] sm:$0xff]  ;;  %v3256_v54 = vand.u32 4294901760, %v112_v31  ;;  %v3263_v59 = vand.u32 4294901760, %v111_v37 }
  0x45   :  { %341 = vmatmul.mubr.f32.vlgmr.msra.gmra.mxu1 %v3093_v14  ;;  %472 = vmatprep.subr.mxu1 %v3086_v10  ;;  %v3212_v16 = vsub.f32 %v99_v5, %v3197_v8 }
  0x46   :  { %249 = vmatmul.mubr.f32.gmra.mxu0 %v248_v44  ;;  %474 = vmatpush1.msra.mxu1 %v3088_v11  ;;  %v3270_v5 = vsub.f32 %v112_v31, %v3256_v54 }
  0x47   :  { %390 = vmatprep.subr.mxu0 %v3096_v15  ;;  %346 = vmatprep.mubr.f32.mxu1 %v3019_v0  ;;  %v4049_v15 = vand.u32 4294901760, %v3195_v7 }
  0x48   :  { %393 = vmatpush1.msra.mxu0 %v3103_v19  ;;  %426 = vmatprep.mubr.f32.mxu0 %v3019_v0 }
  0x49   :  { %348 = vmatmul.mubr.f32.gmra.mxu1 %v3105_v20  ;;  %476 = vmatprep.subr.mxu1 %v3084_v6 }
  0x4a   :  { %429 = vmatmul.mubr.f32.vlgmr.msra.gmra.mxu0 %v234_v21  ;;  %478 = vmatpush1.msra.mxu1 %v3090_v12 }
  0x4b   :  { %561 = vmatprep.subr.mxu0 %v285_v23  ;;  %434 = vmatprep.mubr.f32.mxu0 %v3019_v0 }
  0x4c   :  { %511 = vmatprep.mubr.f32.mxu1 %v3019_v0  ;;  %565 = vmatpush1.msra.mxu0 %v291_v24  ;;  %v859_v24 = vsub.f32 %v3195_v7, %v4049_v15 }
  0x4d   :  { %515 = vmatmul.mubr.f32.vlgmr.msra.gmra.mxu1 %v235_v27  ;;  %650 = vmatprep.subr.mxu1 %v3086_v10  ;;  %v97_v27 = vld [vmem:[#allocation7 + $0x50] sm:$0xff] }
  0x4e   :  { %437 = vmatmul.mubr.f32.gmra.mxu0 %v3113_v26  ;;  %652 = vmatpush1.msra.mxu1 %v3088_v11  ;;  %v3202_v11 = vsub.f32 %v115_v3, %v3190_v4  ;;  %v3232_v26 = vsub.f32 %v98_v13, %v3214_v17  ;;  %v3250_v40 = vand.u32 4294901760, %v97_v27 }
  0x4f   :  { %569 = vmatprep.subr.mxu0 %v297_v22  ;;  %520 = vmatprep.mubr.f32.mxu1 %v3019_v0  ;;  %v3224_v22 = vand.u32 4294901760, %v113_v18 }
  0x50   :  { %573 = vmatpush1.msra.mxu0 %v303_v25  ;;  %606 = vmatprep.mubr.f32.mxu0 %v3019_v0  ;;  %v4046_v25 = vand.u32 4294901760, %v3212_v16  ;;  %v4043_v34 = vand.u32 4294901760, %v3232_v26 }
  0x51   :  { %524 = vmatmul.mubr.f32.gmra.mxu1 %v246_v32  ;;  %654 = vmatprep.subr.mxu1 %v3084_v6  ;;  %v4052_v6 = vand.u32 4294901760, %v3182_v1  ;;  %v860_v32 = vand.u32 4294901760, %v859_v24  ;;  %v3245_v35 = vsub.f32 %v113_v18, %v3224_v22  ;;  %v3280_v18 = vsub.f32 %v111_v37, %v3263_v59 }
  0x52   :  { %608 = vmatmul.mubr.f32.vlgmr.msra.gmra.mxu0 %v3093_v14  ;;  %656 = vmatpush1.msra.mxu1 %v3090_v12  ;;  %v3204_v12 = vand.u32 4294901760, %v114_v9  ;;  %v866_v33 = vsub.f32 %v3212_v16, %v4046_v25  ;;  %v873_v44 = vsub.f32 %v3232_v26, %v4043_v34 }
  0x53   :  { %613 = vmatprep.mubr.f32.mxu0 %v3019_v0  ;;  %689 = vmatprep.mubr.f32.mxu1 %v3019_v0  ;;  %v4042_v52 = vand.u32 4294901760, %v3245_v35  ;;  %4180 = vst [vmem:[#allocation18_spill] sm:$0xff] %v3280_v18 }
  0x54   :  { %2385 = vmatprep.subr.mxu1 %v958_v55  ;;  %2347 = vmatprep.subr.mxu0 %v3120_v41  ;;  %v3222_v21 = vsub.f32 %v114_v9, %v3204_v12  ;;  %v867_v43 = vand.u32 4294901760, %v866_v33  ;;  %v110_v55 = vld [vmem:[#allocation7 + $0xb8] sm:$0xff]  ;;  %v874_v63 = vand.u32 4294901760, %v873_v44  ;;  %v3272_v9 = vand.u32 4294901760, %v95_v42 }
  0x55   :  { %691 = vmatmul.mubr.f32.vlgmr.msra.gmra.mxu1 %v3093_v14  ;;  %2348 = vmatpush3.msra.mxu0 %v3123_v45  ;;  %v852_v14 = vsub.f32 %v3182_v1, %v4052_v6  ;;  %v992_v3 = vsub.f32 %v3245_v35, %v4042_v52  ;;  %v4041_v33 = vand.u32 4294901760, %v3280_v18  ;;  %v105_v6 = vld [vmem:[#allocation7 + $0x90] sm:$0xff] }
  0x56   :  { %615 = vmatmul.mubr.f32.gmra.mxu0 %v3105_v20  ;;  %696 = vmatprep.mubr.f32.mxu1 %v3019_v0  ;;  %v3188_v0 = vsub.f32 %v116_v61, %v3179_v62  ;;  %v4044_v30 = vand.u32 4294901760, %v3222_v21  ;;  %v94_v61 = vld [vmem:[#allocation7 + $0x38] sm:$0xff] }
  0x57   :  { %2386 = vmatpush3.msra.mxu1 %v846_v57  ;;  %2349 = vmatprep.subr.mxu0 %v3128_v47  ;;  %v853_v23 = vand.u32 4294901760, %v852_v14  ;;  %v3259_v57 = vsub.f32 %v97_v27, %v3250_v40  ;;  %v993_v24 = vand.u32 4294901760, %v992_v3  ;;  %v4038_v27 = vand.u32 4294901760, %v3270_v5  ;;  %v108_v3 = vld [vmem:[#allocation7 + $0xa8] sm:$0xff] }
  0x58   :  { %2387 = vmatprep.subr.mxu1 %v965_v58  ;;  %2350 = vmatpush3.msra.mxu0 %v3177_v60  ;;  %v4051_v10 = vand.u32 4294901760, %v3188_v0  ;;  %v985_v39 = vsub.f32 %v3222_v21, %v4044_v30  ;;  %v3261_v58 = vand.u32 4294901760, %v96_v36  ;;  %v91_v30 = vld [vmem:[#allocation7 + $0x20] sm:$0xff] }
  0x59   :  { %698 = vmatmul.mubr.f32.gmra.mxu1 %v3105_v20  ;;  %2351 = vmatprep.subr.mxu0 %v3179_v62  ;;  %v4047_v20 = vand.u32 4294901760, %v3202_v11  ;;  %v4040_v13 = vand.u32 4294901760, %v3259_v57  ;;  %v999_v37 = vsub.f32 %v3270_v5, %v4038_v27 }
  0x5a   :  { %2352 = vmatpush3.msra.mxu0 %v3184_v2  ;;  %v971_v19 = vsub.f32 %v3188_v0, %v4051_v10  ;;  %2388 = vmatpush3.msra.mxu1 %v853_v23  ;;  %v986_v56 = vand.u32 4294901760, %v985_v39  ;;  %v3277_v14 = vsub.f32 %v96_v36, %v3261_v58  ;;  %v109_v23 = vld [vmem:[#allocation7 + $0xb0] sm:$0xff] }
  0x5b   :  { %2353 = vmatprep.subr.mxu0 %v3190_v4  ;;  %v978_v29 = vsub.f32 %v3202_v11, %v4047_v20  ;;  %v880_v31 = vsub.f32 %v3259_v57, %v4040_v13  ;;  %v107_v13 = vld [vmem:[#allocation7 + $0xa0] sm:$0xff]  ;;  %v3336_v20 = vand.u32 4294901760, %v108_v3 }
  0x5c   :  { %2354 = vmatpush3.msra.mxu0 %v3197_v8  ;;  %v972_v28 = vand.u32 4294901760, %v971_v19  ;;  %4179 = vst [vmem:[#allocation17_spill] sm:$0xff] %v3277_v14  ;;  %v3282_v19 = vand.u32 4294901760, %v110_v55  ;;  %v3343_v15 = vand.u32 4294901760, %v107_v13 }
  0x5d   :  { %2355 = vmatprep.subr.mxu0 %v3204_v12  ;;  %v979_v38 = vand.u32 4294901760, %v978_v29  ;;  %v3289_v29 = vand.u32 4294901760, %v94_v61  ;;  %v881_v44 = vand.u32 4294901760, %v880_v31  ;;  %4185 = vst [vmem:[#allocation23_spill] sm:$0xff] %v3336_v20  ;;  %v3350_v10 = vsub.f32 %v108_v3, %v3336_v20 }
  0x5e   :  { %2356 = vmatpush3.msra.mxu0 %v3214_v17  ;;  %2389 = vmatprep.subr.mxu1 %v972_v28  ;;  %v3287_v28 = vsub.f32 %v95_v42, %v3272_v9  ;;  %v3298_v36 = vsub.f32 %v110_v55, %v3282_v19  ;;  %v3308_v42 = vand.u32 4294901760, %v109_v23  ;;  %4188 = vst [vmem:[#allocation26_spill] sm:$0xff] %v3343_v15 }
  0x5f   :  { %2357 = vmatprep.subr.mxu0 %v3224_v22  ;;  %2390 = vmatpush3.msra.mxu1 %v860_v32  ;;  %v4039_v32 = vand.u32 4294901760, %v3277_v14  ;;  %v3306_v39 = vsub.f32 %v94_v61, %v3289_v29  ;;  %v1000_v61 = vand.u32 4294901760, %v999_v37  ;;  %4189 = vst [vmem:[#allocation27_spill] sm:$0xff] %v3350_v10 }
  0x60   :  { %2391 = vmatprep.subr.mxu1 %v979_v38  ;;  %2358 = vmatpush3.msra.mxu0 %v3250_v40  ;;  %4181 = vst [vmem:[#allocation19_spill] sm:$0xff] %v3287_v28  ;;  %4182 = vst [vmem:[#allocation20_spill] sm:$0xff] %v3298_v36  ;;  %v4045_v38 = vand.u32 4294901760, %v3287_v28  ;;  %v3324_v27 = vsub.f32 %v109_v23, %v3308_v42 }
  0x61   :  { %2392 = vmatpush3.msra.mxu1 %v867_v43  ;;  %2359 = vmatprep.subr.mxu0 %v3256_v54  ;;  %4183 = vst [vmem:[#allocation21_spill] sm:$0xff] %v3306_v39  ;;  %v93_v43 = vld [vmem:[#allocation7 + $0x30] sm:$0xff]  ;;  %v887_v55 = vsub.f32 %v3277_v14, %v4039_v32  ;;  %v4050_v31 = vand.u32 4294901760, %v3306_v39  ;;  %v92_v32 = vld [vmem:[#allocation7 + $0x28] sm:$0xff] }
  0x62   :  { %2393 = vmatprep.subr.mxu1 %v986_v56  ;;  %2360 = vmatpush3.msra.mxu0 %v3261_v58  ;;  %v1006_v56 = vsub.f32 %v3280_v18, %v4041_v33  ;;  %4184 = vst [vmem:[#allocation22_spill] sm:$0xff] %v3324_v27  ;;  %v3330_v34 = vand.u32 4294901760, %v93_v43  ;;  %v4053_v25 = vand.u32 4294901760, %v3324_v27 }
  0x63   :  { %2394 = vmatpush3.msra.mxu1 %v874_v63  ;;  %2361 = vmatprep.subr.mxu0 %v3263_v59  ;;  %v4048_v63 = vand.u32 4294901760, %v3298_v36  ;;  %v888_v33 = vand.u32 4294901760, %v887_v55  ;;  %v901_v23 = vsub.f32 %v3306_v39, %v4050_v31 }
  0x64   :  { %2362 = vmatpush3.msra.mxu0 %v3272_v9  ;;  %2395 = vmatprep.subr.mxu1 %v993_v24  ;;  %v894_v24 = vsub.f32 %v3287_v28, %v4045_v38  ;;  %v1007_v52 = vand.u32 4294901760, %v1006_v56  ;;  %v3339_v56 = vsub.f32 %v93_v43, %v3330_v34  ;;  %v1020_v31 = vsub.f32 %v3324_v27, %v4053_v25 }
  0x65   :  { %2363 = vmatprep.subr.mxu0 %v3282_v19  ;;  %2396 = vmatpush3.msra.mxu1 %v881_v44  ;;  %v1013_v37 = vsub.f32 %v3298_v36, %v4048_v63  ;;  %v106_v44 = vld [vmem:[#allocation7 + $0x98] sm:$0xff]  ;;  %v3341_v63 = vand.u32 4294901760, %v92_v32  ;;  %v4060_v25 = vand.u32 4294901760, %v3350_v10 }
  0x66   :  { %2364 = vmatpush3.msra.mxu0 %v3289_v29  ;;  %2397 = vmatprep.subr.mxu1 %v1000_v61  ;;  %v895_v38 = vand.u32 4294901760, %v894_v24  ;;  %4186 = vst [vmem:[#allocation24_spill] sm:$0xff] %v3339_v56  ;;  %v90_v61 = vld [vmem:[#allocation7 + $0x18] sm:$0xff]  ;;  %v902_v24 = vand.u32 4294901760, %v901_v23  ;;  %v4056_v43 = vand.u32 4294901760, %v3339_v56  ;;  %v3362_v23 = vand.u32 4294901760, %v106_v44 }
  0x67   :  { %2365 = vmatprep.subr.mxu0 %v3308_v42  ;;  %2398 = vmatpush3.msra.mxu1 %v888_v33  ;;  %v1014_v55 = vand.u32 4294901760, %v1013_v37  ;;  %4187 = vst [vmem:[#allocation25_spill] sm:$0xff] %v3341_v63  ;;  %v3352_v33 = vand.u32 4294901760, %v91_v30  ;;  %v3357_v37 = vsub.f32 %v92_v32, %v3341_v63  ;;  %v1021_v3 = vand.u32 4294901760, %v1020_v31 }
  0x68   :  { %2366 = vmatpush3.msra.mxu0 %v3330_v34  ;;  %2399 = vmatprep.subr.mxu1 %v1007_v52  ;;  %v3360_v52 = vsub.f32 %v107_v13, %v3343_v15  ;;  %4193 = vst [vmem:[#allocation31_spill] sm:$0xff] %v3362_v23  ;;  %v908_v13 = vsub.f32 %v3339_v56, %v4056_v43  ;;  %v3388_v43 = vand.u32 4294901760, %v105_v6 }
  0x69   :  { %4190 = vst [vmem:[#allocation28_spill] sm:$0xff] %v3352_v33  ;;  %2367 = vmatprep.subr.mxu0 %v3336_v20  ;;  %2400 = vmatpush3.msra.mxu1 %v895_v38  ;;  %4191 = vst [vmem:[#allocation29_spill] sm:$0xff] %v3357_v37  ;;  %v3367_v53 = vsub.f32 %v91_v30, %v3352_v33  ;;  %v3369_v38 = vand.u32 4294901760, %v90_v61  ;;  %v4067_v32 = vand.u32 4294901760, %v3357_v37 }
  0x6a   :  { %4192 = vst [vmem:[#allocation30_spill] sm:$0xff] %v3360_v52  ;;  %2368 = vmatpush3.msra.mxu0 %v3341_v63  ;;  %2401 = vmatprep.subr.mxu1 %v1014_v55  ;;  %v3378_v31 = vsub.f32 %v106_v44, %v3362_v23  ;;  %v1027_v30 = vsub.f32 %v3350_v10, %v4060_v25  ;;  %4198 = vst [vmem:[#allocation36_spill] sm:$0xff] %v3388_v43  ;;  %v909_v51 = vand.u32 4294901760, %v908_v13  ;;  %v104_v55 = vld [vmem:[#allocation7 + $0x88] sm:$0xff] }
  0x6b   :  { %4194 = vst [vmem:[#allocation32_spill] sm:$0xff] %v3367_v53  ;;  %4195 = vst [vmem:[#allocation33_spill] sm:$0xff] %v3369_v38  ;;  %2369 = vmatprep.subr.mxu0 %v3343_v15  ;;  %2402 = vmatpush3.msra.mxu1 %v902_v24  ;;  %v3386_v24 = vsub.f32 %v90_v61, %v3369_v38  ;;  %v915_v44 = vsub.f32 %v3357_v37, %v4067_v32  ;;  %v4200_v10 = vand.u32 4294901760, %v3367_v53  ;;  %v88_v32 = vld [vmem:[#allocation7 + $0x8] sm:$0xff]  ;;  %v103_v37 = vld [vmem:[#allocation7 + $0x80] sm:$0xff] }
  0x6c   :  { %4196 = vst [vmem:[#allocation34_spill] sm:$0xff] %v3378_v31  ;;  %2370 = vmatpush3.msra.mxu0 %v3352_v33  ;;  %2403 = vmatprep.subr.mxu1 %v1021_v3  ;;  %v4199_v3 = vand.u32 4294901760, %v3360_v52  ;;  %v1028_v61 = vand.u32 4294901760, %v1027_v30  ;;  %v3404_v39 = vsub.f32 %v105_v6, %v3388_v43  ;;  %v3416_v36 = vand.u32 4294901760, %v104_v55 }
  0x6d   :  { %4197 = vst [vmem:[#allocation35_spill] sm:$0xff] %v3386_v24  ;;  %2371 = vmatprep.subr.mxu0 %v3362_v23  ;;  %v922_v27 = vsub.f32 %v3367_v53, %v4200_v10  ;;  %v4080_v13 = vand.u32 4294901760, %v3386_v24  ;;  %2404 = vmatpush3.msra.mxu1 %v909_v51  ;;  %v87_v23 = vld [vmem:[#allocation7] sm:$0xff] }
  0x6e   :  { %v1034_v56 = vsub.f32 %v3360_v52, %v4199_v3  ;;  %2372 = vmatpush3.msra.mxu0 %v3369_v38  ;;  %4201 = vst [vmem:[#allocation37_spill] sm:$0xff] %v3404_v39  ;;  %v916_v3 = vand.u32 4294901760, %v915_v44  ;;  %v4202_v52 = vand.u32 4294901760, %v3378_v31  ;;  %v3410_v38 = vand.u32 4294901760, %v89_v49  ;;  %2405 = vmatprep.subr.mxu1 %v1028_v61  ;;  %4204 = vst [vmem:[#allocation39_spill] sm:$0xff] %v3416_v36 }
  0x6f   :  { %2373 = vmatprep.subr.mxu0 %v3388_v43  ;;  %v923_v10 = vand.u32 4294901760, %v922_v27  ;;  %v929_v6 = vsub.f32 %v3386_v24, %v4080_v13  ;;  %v4081_v53 = vand.u32 4294901760, %v3404_v39  ;;  %v3421_v44 = vand.u32 4294901760, %v88_v32 }
  0x70   :  { %v1035_v25 = vand.u32 4294901760, %v1034_v56  ;;  %v1041_v30 = vsub.f32 %v3378_v31, %v4202_v52  ;;  %4203 = vst [vmem:[#allocation38_spill] sm:$0xff] %v3410_v38  ;;  %2406 = vmatpush3.msra.mxu1 %v916_v3  ;;  %v3419_v56 = vsub.f32 %v89_v49, %v3410_v38  ;;  %v3423_v52 = vand.u32 4294901760, %v103_v37  ;;  %2374 = vmatpush3.msra.mxu0 %v3410_v38 }
  0x71   :  { %4206 = vst [vmem:[#allocation41_spill] sm:$0xff] %v3421_v44  ;;  %v930_v27 = vand.u32 4294901760, %v929_v6  ;;  %v1048_v61 = vsub.f32 %v3404_v39, %v4081_v53  ;;  %v3430_v13 = vsub.f32 %v104_v55, %v3416_v36  ;;  %v3432_v3 = vand.u32 4294901760, %v87_v23  ;;  %2375 = vmatprep.subr.mxu0 %v3416_v36 }
  0x72   :  { %v1042_v51 = vand.u32 4294901760, %v1041_v30  ;;  %4205 = vst [vmem:[#allocation40_spill] sm:$0xff] %v3419_v56  ;;  %4207 = vst [vmem:[#allocation42_spill] sm:$0xff] %v3423_v52  ;;  %2407 = vmatprep.subr.mxu1 %v1035_v25  ;;  %v4082_v49 = vand.u32 4294901760, %v3419_v56  ;;  %v3437_v30 = vsub.f32 %v88_v32, %v3421_v44  ;;  %v3440_v25 = vsub.f32 %v103_v37, %v3423_v52 }
  0x73   :  { %4208 = vst [vmem:[#allocation43_spill] sm:$0xff] %v3430_v13  ;;  %4209 = vst [vmem:[#allocation44_spill] sm:$0xff] %v3432_v3  ;;  %2408 = vmatpush3.msra.mxu1 %v923_v10  ;;  %2376 = vmatpush3.msra.mxu0 %v3421_v44  ;;  %v1049_v6 = vand.u32 4294901760, %v1048_v61  ;;  %v4085_v55 = vand.u32 4294901760, %v3430_v13  ;;  %v3445_v53 = vsub.f32 %v87_v23, %v3432_v3 }
  0x74   :  { %4210 = vst [vmem:[#allocation45_spill] sm:$0xff] %v3437_v30  ;;  %4211 = vst [vmem:[#allocation46_spill] sm:$0xff] %v3440_v25  ;;  %2409 = vmatprep.subr.mxu1 %v1042_v51  ;;  %2377 = vmatprep.subr.mxu0 %v3423_v52  ;;  %v936_v32 = vsub.f32 %v3419_v56, %v4082_v49  ;;  %v4090_v10 = vand.u32 4294901760, %v3437_v30  ;;  %v4094_v37 = vand.u32 4294901760, %v3440_v25 }
  0x75   :  { %4212 = vst [vmem:[#allocation47_spill] sm:$0xff] %v3445_v53  ;;  %2410 = vmatpush3.msra.mxu1 %v930_v27  ;;  %2378 = vmatpush3.msra.mxu0 %v3432_v3  ;;  %v1055_v51 = vsub.f32 %v3430_v13, %v4085_v55  ;;  %v4095_v23 = vand.u32 4294901760, %v3445_v53 }
  0x76   :  { %2411 = vmatprep.subr.mxu1 %v1049_v6  ;;  %2423 = vmatprep.subr.mxu0 %v3126_v46  ;;  %v937_v27 = vand.u32 4294901760, %v936_v32  ;;  %v943_v61 = vsub.f32 %v3437_v30, %v4090_v10  ;;  %v1062_v49 = vsub.f32 %v3440_v25, %v4094_v37  ;;  %v140_v32 = vlaneseq }
  0x77   :  { %v1056_v56 = vand.u32 4294901760, %v1055_v51  ;;  %v950_v6 = vsub.f32 %v3445_v53, %v4095_v23  ;;  %v86_v51 = vld [vmem:[%s4032_s2] sm:$0x3] }
  0x78   :  { %2412 = vmatpush3.msra.mxu1 %v937_v27  ;;  %v944_v55 = vand.u32 4294901760, %v943_v61  ;;  %v1063_v13 = vand.u32 4294901760, %v1062_v49  ;;  %v141_v10 = vshrl.u32 %v140_v32, 7 }
  0x79   :  { %2413 = vmatprep.subr.mxu1 %v1056_v56  ;;  %v951_v39 = vand.u32 4294901760, %v950_v6 }
  0x7a   :  { %2414 = vmatpush3.msra.mxu1 %v944_v55  ;;  %v142_v46 = vsub.s32 0, %v141_v10  ;;  %v146_v61 = vsub.s32 1, %v141_v10 }
  0x7b   :  { %2415 = vmatprep.subr.mxu1 %v1063_v13 }
  0x7c   :  { %2416 = vmatpush3.msra.mxu1 %v951_v39  ;;  %v143_v27 = vrot.slane %v86_v51, %v142_v46  ;;  %v147_v39 = vrot.slane %v86_v51, %v146_v61 }
  0x7d   :  { %2461 = vmatprep.subr.mxu1 %v3120_v41 }
 0x102   :  { %v239_v30 = vpop.f32.mrf.mxu0 }
 0x103   :  { %v240_v13 = vadd.f32 %v239_v30, %v143_v27 }
 0x104   :  { %v241_v37 = vpop.f32.mrf.mxu0 }
 0x105   :  { %v342_v23 = vpop.f32.mrf.mxu1  ;;  %v242_v41 = vadd.f32 %v241_v37, %v147_v39 }
 0x106   :  { %v250_v49 = vpop.f32.mrf.mxu0  ;;  %v343_v3 = vadd.f32 %v342_v23, %v240_v13 }
 0x107   :  { %v344_v56 = vpop.f32.mrf.mxu1  ;;  %v251_v31 = vadd.f32 %v250_v49, %v143_v27 }
 0x108   :  { %v252_v6 = vpop.f32.mrf.mxu0  ;;  %v345_v36 = vadd.f32 %v344_v56, %v242_v41 }
 0x109   :  { %v349_v55 = vpop.f32.mrf.mxu1  ;;  %v253_v10 = vadd.f32 %v252_v6, %v147_v39 }
 0x10a   :  { %v430_v53 = vpop.f32.mrf.mxu0  ;;  %v350_v33 = vadd.f32 %v349_v55, %v251_v31 }
 0x10b   :  { %v351_v25 = vpop.f32.mrf.mxu1  ;;  %v431_v38 = vadd.f32 %v430_v53, %v343_v3 }
 0x10c   :  { %v432_v24 = vpop.f32.mrf.mxu0  ;;  %v352_v51 = vadd.f32 %v351_v25, %v253_v10 }
 0x10d   :  { %v516_v32 = vpop.f32.mrf.mxu1  ;;  %v433_v28 = vadd.f32 %v432_v24, %v345_v36 }
 0x10e   :  { %v438_v52 = vpop.f32.mrf.mxu0  ;;  %v517_v15 = vadd.f32 %v516_v32, %v431_v38 }
 0x10f   :  { %v518_v44 = vpop.f32.mrf.mxu1  ;;  %v439_v61 = vadd.f32 %v438_v52, %v350_v33 }
 0x110   :  { %v440_v43 = vpop.f32.mrf.mxu0  ;;  %v519_v63 = vadd.f32 %v518_v44, %v433_v28 }
 0x111   :  { %v525_v46 = vpop.f32.mrf.mxu1  ;;  %v441_v27 = vadd.f32 %v440_v43, %v352_v51 }
 0x112   :  { %v609_v18 = vpop.f32.mrf.mxu0  ;;  %v526_v23 = vadd.f32 %v525_v46, %v439_v61 }
 0x113   :  { %v527_v30 = vpop.f32.mrf.mxu1  ;;  %v610_v14 = vadd.f32 %v609_v18, %v517_v15 }
 0x114   :  { %v611_v20 = vpop.f32.mrf.mxu0  ;;  %v528_v3 = vadd.f32 %v527_v30, %v441_v27 }
 0x115   :  { %v692_v37 = vpop.f32.mrf.mxu1  ;;  %v612_v49 = vadd.f32 %v611_v20, %v519_v63 }
 0x116   :  { %v616_v13 = vpop.f32.mrf.mxu0  ;;  %v693_v41 = vadd.f32 %v692_v37, %v610_v14 }
 0x117   :  { %v694_v53 = vpop.f32.mrf.mxu1  ;;  %v617_v56 = vadd.f32 %v616_v13, %v526_v23 }
 0x118   :  { %v704_v6 = vmax.f32 %v693_v41, 0.0  ;;  %v618_v31 = vpop.f32.mrf.mxu0  ;;  %v695_v36 = vadd.f32 %v694_v53, %v612_v49 }
 0x119   :  { %v699_v38 = vpop.f32.mrf.mxu1  ;;  %v619_v25 = vadd.f32 %v618_v31, %v528_v3  ;;  %v4216_v3 = vld [vmem:[#allocation23_spill] sm:$0xff]  ;;  %v4219_v31 = vld [vmem:[#allocation18_spill] sm:$0xff] }
 0x11a   :  { %v3472_v24 = vand.u32 4294901760, %v704_v6  ;;  %v705_v33 = vmax.f32 %v695_v36, 0.0  ;;  %v700_v28 = vadd.f32 %v699_v38, %v617_v56  ;;  %v4217_v56 = vld [vmem:[#allocation17_spill] sm:$0xff]  ;;  %v4220_v36 = vld [vmem:[#allocation26_spill] sm:$0xff]  ;;  %v4221_v38 = vld [vmem:[#allocation19_spill] sm:$0xff] }
 0x11b   :  { %v701_v15 = vpop.f32.mrf.mxu1 }
 0x11c   :  { %4213 = vst [vmem:[#allocation48_spill] sm:$0xff] %v3472_v24  ;;  %v3475_v18 = vsub.f32 %v704_v6, %v3472_v24  ;;  %v3477_v43 = vand.u32 4294901760, %v705_v33  ;;  %v706_v20 = vmax.f32 %v700_v28, 0.0  ;;  %v702_v14 = vadd.f32 %v701_v15, %v619_v25  ;;  %v4218_v6 = vld [vmem:[#allocation25_spill] sm:$0xff]  ;;  %v4222_v25 = vld [vmem:[#allocation28_spill] sm:$0xff]  ;;  %v4224_v28 = vld [vmem:[#allocation31_spill] sm:$0xff] }
 0x11d   :  { %v4225_v15 = vld [vmem:[#allocation21_spill] sm:$0xff] }
 0x11e   :  { %v818_v63 = vand.u32 4294901760, %v3475_v18  ;;  %v811_v44 = vsub.f32 %v705_v33, %v3477_v43  ;;  %v3481_v52 = vand.u32 4294901760, %v706_v20  ;;  %v707_v55 = vmax.f32 %v702_v14, 0.0  ;;  %1066 = vmatprep.mubr.f32.mxu1 %v3477_v43  ;;  %v4223_v33 = vld [vmem:[#allocation20_spill] sm:$0xff]  ;;  %v4227_v14 = vld [vmem:[#allocation22_spill] sm:$0xff] }
 0x11f   :  { %1068 = vmatmul.mubr.f32.vlgmr.msra.gmra.mxu1 %v3472_v24  ;;  %v4243_v24 = vld [vmem:[#allocation37_spill] sm:$0xff] }
 0x120   :  { %4214 = vst [vmem:[#allocation49_spill] sm:$0xff] %v3481_v52  ;;  %v3486_v39 = vsub.f32 %v706_v20, %v3481_v52  ;;  %v3488_v32 = vand.u32 4294901760, %v707_v55  ;;  %2462 = vmatpush3.msra.mxu1 %v3123_v45  ;;  %v812_v46 = vand.u32 4294901760, %v811_v44  ;;  %v819_v10 = vsub.f32 %v3475_v18, %v818_v63  ;;  %v4226_v20 = vld [vmem:[#allocation33_spill] sm:$0xff] }
 0x121   :  { %2463 = vmatprep.subr.mxu1 %v3128_v47 }
 0x122   :  { %4215 = vst [vmem:[#allocation50_spill] sm:$0xff] %v3488_v32  ;;  %v3496_v30 = vsub.f32 %v707_v55, %v3488_v32  ;;  %2464 = vmatpush3.msra.mxu1 %v3177_v60  ;;  %1073 = vmatprep.mubr.f32.mxu1 %v3488_v32  ;;  %v813_v51 = vsub.f32 %v811_v44, %v812_v46  ;;  %v4131_v61 = vand.u32 4294901760, %v3486_v39  ;;  %v820_v23 = vand.u32 4294901760, %v819_v10  ;;  %v4229_v55 = vld [vmem:[#allocation24_spill] sm:$0xff]  ;;  %v4231_v10 = vld [vmem:[#allocation27_spill] sm:$0xff] }
 0x123   :  { %2465 = vmatprep.subr.mxu1 %v3179_v62  ;;  %1075 = vmatmul.mubr.f32.gmra.mxu1 %v3481_v52  ;;  %v4241_v52 = vld [vmem:[#allocation35_spill] sm:$0xff] }
 0x124   :  { %2466 = vmatpush3.msra.mxu1 %v3184_v2  ;;  %1326 = vmatprep.mubr.f32.mxu1 %v812_v46  ;;  %v814_v37 = vand.u32 4294901760, %v813_v51  ;;  %v4132_v27 = vand.u32 4294901760, %v3496_v30  ;;  %v834_v13 = vsub.f32 %v3486_v39, %v4131_v61  ;;  %v4230_v46 = vld [vmem:[#allocation38_spill] sm:$0xff]  ;;  %v4232_v51 = vld [vmem:[#allocation39_spill] sm:$0xff]  ;;  %v4242_v32 = vand.u32 4294901760, %v3496_v30 }
 0x125   :  { %2467 = vmatprep.subr.mxu1 %v3190_v4  ;;  %v4239_v61 = vld [vmem:[#allocation34_spill] sm:$0xff] }
 0x126   :  { %2468 = vmatpush3.msra.mxu1 %v3197_v8  ;;  %815 = vmatprep.mubr.f32.mxu0 %v814_v37  ;;  %v828_v49 = vsub.f32 %v3496_v30, %v4132_v27  ;;  %v835_v53 = vand.u32 4294901760, %v834_v13  ;;  %v4233_v37 = vld [vmem:[#allocation29_spill] sm:$0xff]  ;;  %v4236_v13 = vld [vmem:[#allocation42_spill] sm:$0xff]  ;;  %v4240_v27 = vld [vmem:[#allocation15_spill] sm:$0xff] }
 0x127   :  { %2469 = vmatprep.subr.mxu1 %v3204_v12  ;;  %821 = vmatmul.mubr.f32.vlgmr.msra.gmra.mxu0 %v820_v23  ;;  %v4234_v23 = vld [vmem:[#allocation41_spill] sm:$0xff] }
 0x128   :  { %2424 = vmatpush3.msra.mxu0 %v3136_v48  ;;  %2470 = vmatpush3.msra.mxu1 %v3214_v17  ;;  %v829_v41 = vand.u32 4294901760, %v828_v49  ;;  %v4235_v49 = vld [vmem:[#allocation30_spill] sm:$0xff] }
 0x129   :  { %2425 = vmatprep.subr.mxu0 %v3142_v50  ;;  %2471 = vmatprep.subr.mxu1 %v3224_v22 }
 0x12a   :  { %2426 = vmatpush3.msra.mxu0 %v3182_v1  ;;  %2472 = vmatpush3.msra.mxu1 %v3250_v40 }
 0x12b   :  { %830 = vmatprep.mubr.f32.mxu0 %v829_v41  ;;  %2427 = vmatprep.subr.mxu0 %v3188_v0  ;;  %v4237_v41 = vld [vmem:[#allocation32_spill] sm:$0xff] }
 0x12c   :  { %2473 = vmatprep.subr.mxu1 %v3256_v54  ;;  %836 = vmatmul.mubr.f32.gmra.mxu0 %v835_v53  ;;  %v4238_v53 = vld [vmem:[#allocation44_spill] sm:$0xff] }
 0x12d   :  { %2428 = vmatpush3.msra.mxu0 %v3195_v7  ;;  %2474 = vmatpush3.msra.mxu1 %v3261_v58 }
 0x12e   :  { %2429 = vmatprep.subr.mxu0 %v3202_v11  ;;  %1210 = vmatprep.mubr.f32.mxu0 %v811_v44  ;;  %v4228_v44 = vld [vmem:[#allocation36_spill] sm:$0xff] }
 0x12f   :  { %2475 = vmatprep.subr.mxu1 %v3263_v59  ;;  %2430 = vmatpush3.msra.mxu0 %v3212_v16 }
 0x130   :  { %2476 = vmatpush3.msra.mxu1 %v3272_v9  ;;  %2431 = vmatprep.subr.mxu0 %v3222_v21 }
 0x131   :  { %2477 = vmatprep.subr.mxu1 %v3282_v19  ;;  %2432 = vmatpush3.msra.mxu0 %v3232_v26 }
 0x132   :  { %2478 = vmatpush3.msra.mxu1 %v3289_v29  ;;  %2433 = vmatprep.subr.mxu0 %v3245_v35 }
 0x133   :  { %2479 = vmatprep.subr.mxu1 %v3308_v42  ;;  %2434 = vmatpush3.msra.mxu0 %v3259_v57 }
 0x134   :  { %2480 = vmatpush3.msra.mxu1 %v3330_v34  ;;  %2435 = vmatprep.subr.mxu0 %v3270_v5 }
 0x135   :  { %2481 = vmatprep.subr.mxu1 %v4216_v3  ;;  %2436 = vmatpush3.msra.mxu0 %v4217_v56 }
 0x136   :  { %2482 = vmatpush3.msra.mxu1 %v4218_v6  ;;  %2437 = vmatprep.subr.mxu0 %v4219_v31 }
 0x137   :  { %2483 = vmatprep.subr.mxu1 %v4220_v36  ;;  %2438 = vmatpush3.msra.mxu0 %v4221_v38 }
 0x138   :  { %2484 = vmatpush3.msra.mxu1 %v4222_v25  ;;  %2439 = vmatprep.subr.mxu0 %v4223_v33 }
 0x139   :  { %2485 = vmatprep.subr.mxu1 %v4224_v28  ;;  %2440 = vmatpush3.msra.mxu0 %v4225_v15 }
 0x13a   :  { %2486 = vmatpush3.msra.mxu1 %v4226_v20  ;;  %2441 = vmatprep.subr.mxu0 %v4227_v14 }
 0x13b   :  { %2487 = vmatprep.subr.mxu1 %v4228_v44  ;;  %2442 = vmatpush3.msra.mxu0 %v4229_v55 }
 0x13c   :  { %2488 = vmatpush3.msra.mxu1 %v4230_v46  ;;  %2443 = vmatprep.subr.mxu0 %v4231_v10 }
 0x13d   :  { %2489 = vmatprep.subr.mxu1 %v4232_v51  ;;  %2444 = vmatpush3.msra.mxu0 %v4233_v37 }
 0x13e   :  { %2490 = vmatpush3.msra.mxu1 %v4234_v23  ;;  %2445 = vmatprep.subr.mxu0 %v4235_v49 }
 0x13f   :  { %2491 = vmatprep.subr.mxu1 %v4236_v13  ;;  %2446 = vmatpush3.msra.mxu0 %v4237_v41  ;;  %v4244_v41 = vld [vmem:[#allocation40_spill] sm:$0xff] }
 0x140   :  { %2492 = vmatpush3.msra.mxu1 %v4238_v53  ;;  %2447 = vmatprep.subr.mxu0 %v4239_v61  ;;  %v4245_v61 = vld [vmem:[#allocation43_spill] sm:$0xff] }
 0x141   :  { %1330 = vmatmul.mubr.f32.vlgmr.msra.gmra.mxu1 %v818_v63  ;;  %2537 = vmatprep.subr.mxu1 %v4240_v27  ;;  %v4246_v63 = vand.u32 4294901760, %v3486_v39  ;;  %v4247_v27 = vld [vmem:[#allocation45_spill] sm:$0xff] }
 0x142   :  { %2448 = vmatpush3.msra.mxu0 %v4241_v52  ;;  %1337 = vmatprep.mubr.f32.mxu1 %v4242_v32 }
 0x143   :  { %2538 = vmatpush3.msra.mxu1 %v3123_v45  ;;  %2449 = vmatprep.subr.mxu0 %v4243_v24  ;;  %v4248_v45 = vld [vmem:[#allocation46_spill] sm:$0xff] }
 0x144   :  { %2539 = vmatprep.subr.mxu1 %v3128_v47  ;;  %2450 = vmatpush3.msra.mxu0 %v4244_v41  ;;  %v4249_v47 = vld [vmem:[#allocation47_spill] sm:$0xff] }
 0x145   :  { %2540 = vmatpush3.msra.mxu1 %v3177_v60  ;;  %2451 = vmatprep.subr.mxu0 %v4245_v61  ;;  %v4250_v60 = vld [vmem:[#allocation16_spill] sm:$0xff] }
 0x146   :  { %1341 = vmatmul.mubr.f32.gmra.mxu1 %v4246_v63  ;;  %2541 = vmatprep.subr.mxu1 %v3179_v62  ;;  %v4251_v32 = vand.u32 4294901760, %v4250_v60  ;;  %v4252_v62 = vand.u32 4294901760, %v3136_v48  ;;  %v4256_v48 = vand.u32 4294901760, %v3195_v7  ;;  %v4260_v7 = vand.u32 4294901760, %v3232_v26 }
 0x147   :  { %2452 = vmatpush3.msra.mxu0 %v4247_v27  ;;  %2542 = vmatpush3.msra.mxu1 %v3184_v2  ;;  %v4253_v2 = vand.u32 4294901760, %v3142_v50  ;;  %v4257_v50 = vand.u32 4294901760, %v3202_v11  ;;  %v4261_v11 = vand.u32 4294901760, %v3245_v35  ;;  %v4267_v26 = vand.u32 4294901760, %v4223_v33 }
 0x148   :  { %1618 = vmatprep.mubr.f32.mxu1 %v3477_v43  ;;  %2453 = vmatprep.subr.mxu0 %v4248_v45  ;;  %v4269_v35 = vand.u32 4294901760, %v4227_v14 }
 0x149   :  { %2543 = vmatprep.subr.mxu1 %v3190_v4  ;;  %2454 = vmatpush3.msra.mxu0 %v4249_v47  ;;  %v4254_v4 = vand.u32 4294901760, %v3182_v1  ;;  %v4258_v1 = vand.u32 4294901760, %v3212_v16  ;;  %v4263_v16 = vand.u32 4294901760, %v3270_v5 }
 0x14a   :  { %2544 = vmatpush3.msra.mxu1 %v3197_v8  ;;  %1213 = vmatmul.mubr.f32.vlgmr.msra.gmra.mxu0 %v3475_v18  ;;  %v4255_v8 = vand.u32 4294901760, %v3188_v0  ;;  %v4259_v0 = vand.u32 4294901760, %v3222_v21  ;;  %v4265_v21 = vand.u32 4294901760, %v4219_v31  ;;  %v4280_v18 = vld [vmem:[#allocation50_spill] sm:$0xff]  ;;  %v134_v31 = vld [vmem:[#allocation8 + $0x70] sm:$0xff] }
 0x14b   :  { %2499 = vmatprep.subr.mxu0 %v4251_v32  ;;  %2545 = vmatprep.subr.mxu1 %v3204_v12  ;;  %v4262_v12 = vand.u32 4294901760, %v3259_v57  ;;  %v4272_v57 = vand.u32 4294901760, %v4233_v37  ;;  %v3686_v33 = vand.u32 4294901760, %v134_v31 }
 0x14c   :  { %1219 = vmatprep.mubr.f32.mxu0 %v3496_v30  ;;  %2500 = vmatpush3.msra.mxu0 %v4252_v62  ;;  %v4283_v30 = vand.u32 4294901760, %v4245_v61  ;;  %v129_v62 = vld [vmem:[#allocation8 + $0x48] sm:$0xff] }
 0x14d   :  { %2546 = vmatpush3.msra.mxu1 %v3214_v17  ;;  %2501 = vmatprep.subr.mxu0 %v4253_v2  ;;  %v4264_v17 = vand.u32 4294901760, %v4217_v56  ;;  %v4285_v56 = vand.u32 4294901760, %v4247_v27  ;;  %v3698_v14 = vsub.f32 %v134_v31, %v3686_v33  ;;  %v130_v27 = vld [vmem:[#allocation8 + $0x50] sm:$0xff] }
 0x14e   :  { %2547 = vmatprep.subr.mxu1 %v3224_v22  ;;  %2502 = vmatpush3.msra.mxu0 %v4254_v4  ;;  %v4266_v22 = vand.u32 4294901760, %v4221_v38  ;;  %v132_v38 = vld [vmem:[#allocation8 + $0x60] sm:$0xff]  ;;  %v3731_v60 = vand.u32 4294901760, %v130_v27 }
 0x14f   :  { %2548 = vmatpush3.msra.mxu1 %v3250_v40  ;;  %1222 = vmatmul.mubr.f32.gmra.mxu0 %v3486_v39  ;;  %v4270_v40 = vand.u32 4294901760, %v4229_v55  ;;  %v4282_v39 = vand.u32 4294901760, %v4244_v41 }
 0x150   :  { %2503 = vmatprep.subr.mxu0 %v4255_v8  ;;  %2549 = vmatprep.subr.mxu1 %v3256_v54  ;;  %v4271_v54 = vand.u32 4294901760, %v4231_v10  ;;  %v3711_v10 = vand.u32 4294901760, %v3698_v14  ;;  %v3738_v4 = vsub.f32 %v130_v27, %v3731_v60  ;;  %v3740_v8 = vand.u32 4294901760, %v129_v62  ;;  %v121_v27 = vld [vmem:[#allocation8 + $0x8] sm:$0xff] }
 0x151   :  { %2504 = vmatpush3.msra.mxu0 %v4256_v48  ;;  %1507 = vmatprep.mubr.f32.mxu0 %v3477_v43  ;;  %v4281_v43 = vand.u32 4294901760, %v4243_v24  ;;  %v135_v24 = vld [vmem:[#allocation8 + $0x78] sm:$0xff] }
 0x152   :  { %2550 = vmatpush3.msra.mxu1 %v3261_v58  ;;  %2505 = vmatprep.subr.mxu0 %v4257_v50  ;;  %v4273_v58 = vand.u32 4294901760, %v4235_v49  ;;  %v3681_v61 = vand.u32 4294901760, %v135_v24  ;;  %4289 = vst [vmem:[#allocation17_spill] sm:$0xff] %v3711_v10  ;;  %v128_v50 = vld [vmem:[#allocation8 + $0x40] sm:$0xff] }
 0x153   :  { %2551 = vmatprep.subr.mxu1 %v3263_v59  ;;  %2506 = vmatpush3.msra.mxu0 %v4258_v1  ;;  %v4274_v59 = vld [vmem:[#allocation32_spill] sm:$0xff]  ;;  %v3748_v1 = vand.u32 4294901760, %v3738_v4 }
 0x154   :  { %2552 = vmatpush3.msra.mxu1 %v3272_v9  ;;  %2507 = vmatprep.subr.mxu0 %v4259_v0  ;;  %v4275_v5 = vand.u32 4294901760, %v4274_v59  ;;  %v4276_v9 = vld [vmem:[#allocation34_spill] sm:$0xff]  ;;  %v3751_v0 = vsub.f32 %v129_v62, %v3740_v8 }
 0x155   :  { %2553 = vmatprep.subr.mxu1 %v3282_v19  ;;  %2508 = vmatpush3.msra.mxu0 %v4260_v7  ;;  %v4277_v19 = vand.u32 4294901760, %v4276_v9  ;;  %4293 = vst [vmem:[#allocation19_spill] sm:$0xff] %v3748_v1  ;;  %v3753_v7 = vand.u32 4294901760, %v128_v50  ;;  %v125_v59 = vld [vmem:[#allocation8 + $0x28] sm:$0xff] }
 0x156   :  { %2554 = vmatpush3.msra.mxu1 %v3289_v29  ;;  %2509 = vmatprep.subr.mxu0 %v4261_v11  ;;  %v4278_v29 = vld [vmem:[#allocation48_spill] sm:$0xff] }
 0x157   :  { %2555 = vmatprep.subr.mxu1 %v3308_v42  ;;  %2510 = vmatpush3.msra.mxu0 %v4262_v12  ;;  %v4279_v42 = vand.u32 4294901760, %v4241_v52  ;;  %v4287_v52 = vand.u32 4294901760, %v4249_v47  ;;  %v127_v12 = vld [vmem:[#allocation8 + $0x38] sm:$0xff] }
 0x158   :  { %2556 = vmatpush3.msra.mxu1 %v3330_v34  ;;  %2511 = vmatprep.subr.mxu0 %v4263_v16  ;;  %v4268_v34 = vand.u32 4294901760, %v4225_v15  ;;  %v3690_v15 = vand.u32 4294901760, %v132_v38  ;;  %v1780_v16 = vsub.f32 %v3738_v4, %v3748_v1 }
 0x159   :  { %2557 = vmatprep.subr.mxu1 %v4216_v3  ;;  %2512 = vmatpush3.msra.mxu0 %v4264_v17  ;;  %v4284_v3 = vld [vmem:[#allocation49_spill] sm:$0xff]  ;;  %v3762_v17 = vand.u32 4294901760, %v3751_v0 }
 0x15a   :  { %2558 = vmatpush3.msra.mxu1 %v4218_v6  ;;  %2513 = vmatprep.subr.mxu0 %v4265_v21  ;;  %v4286_v6 = vand.u32 4294901760, %v4248_v45  ;;  %v3704_v55 = vsub.f32 %v132_v38, %v3690_v15  ;;  %v3765_v21 = vsub.f32 %v128_v50, %v3753_v7  ;;  %v3840_v50 = vand.u32 4294901760, %v121_v27 }
 0x15b   :  { %2559 = vmatprep.subr.mxu1 %v4220_v36  ;;  %2514 = vmatpush3.msra.mxu0 %v4266_v22  ;;  %v133_v36 = vld [vmem:[#allocation8 + $0x68] sm:$0xff]  ;;  %4294 = vst [vmem:[#allocation28_spill] sm:$0xff] %v3762_v17  ;;  %v3767_v22 = vand.u32 4294901760, %v127_v12 }
 0x15c   :  { %2560 = vmatpush3.msra.mxu1 %v4222_v25  ;;  %2515 = vmatprep.subr.mxu0 %v4267_v26  ;;  %v3684_v25 = vsub.f32 %v135_v24, %v3681_v61  ;;  %v3717_v37 = vand.u32 4294901760, %v3704_v55 }
 0x15d   :  { %2561 = vmatprep.subr.mxu1 %v4224_v28  ;;  %2516 = vmatpush3.msra.mxu0 %v4268_v34  ;;  %v3688_v28 = vand.u32 4294901760, %v133_v36  ;;  %v126_v34 = vld [vmem:[#allocation8 + $0x30] sm:$0xff] }
 0x15e   :  { %2562 = vmatpush3.msra.mxu1 %v4226_v20  ;;  %2517 = vmatprep.subr.mxu0 %v4269_v35  ;;  %v3695_v20 = vand.u32 4294901760, %v3684_v25  ;;  %4291 = vst [vmem:[#allocation18_spill] sm:$0xff] %v3717_v37  ;;  %v1781_v35 = vand.u32 4294901760, %v1780_v16 }
 0x15f   :  { %2563 = vmatprep.subr.mxu1 %v4228_v44  ;;  %2518 = vmatpush3.msra.mxu0 %v4270_v40  ;;  %v3701_v44 = vsub.f32 %v133_v36, %v3688_v28  ;;  %v1787_v40 = vsub.f32 %v3751_v0, %v3762_v17 }
 0x160   :  { %2564 = vmatpush3.msra.mxu1 %v4230_v46  ;;  %2519 = vmatprep.subr.mxu0 %v4271_v54  ;;  %4288 = vst [vmem:[#allocation23_spill] sm:$0xff] %v3695_v20  ;;  %v1745_v46 = vsub.f32 %v3684_v25, %v3695_v20  ;;  %v3774_v54 = vand.u32 4294901760, %v3765_v21 }
 0x161   :  { %2565 = vmatprep.subr.mxu1 %v4232_v51  ;;  %2520 = vmatpush3.msra.mxu0 %v4272_v57  ;;  %v3714_v51 = vand.u32 4294901760, %v3701_v44  ;;  %v3777_v57 = vsub.f32 %v127_v12, %v3767_v22 }
 0x162   :  { %2566 = vmatpush3.msra.mxu1 %v4234_v23  ;;  %2521 = vmatprep.subr.mxu0 %v4273_v58  ;;  %v131_v23 = vld [vmem:[#allocation8 + $0x58] sm:$0xff]  ;;  %v1746_v49 = vand.u32 4294901760, %v1745_v46  ;;  %4295 = vst [vmem:[#allocation20_spill] sm:$0xff] %v3774_v54  ;;  %v3780_v58 = vand.u32 4294901760, %v126_v34  ;;  %v1794_v9 = vsub.f32 %v3765_v21, %v3774_v54  ;;  %v122_v46 = vld [vmem:[#allocation8 + $0x10] sm:$0xff] }
 0x163   :  { %2567 = vmatprep.subr.mxu1 %v4236_v13  ;;  %2522 = vmatpush3.msra.mxu0 %v4275_v5  ;;  %4290 = vst [vmem:[#allocation25_spill] sm:$0xff] %v3714_v51  ;;  %v1752_v13 = vsub.f32 %v3698_v14, %v3711_v10  ;;  %v1759_v41 = vsub.f32 %v3701_v44, %v3714_v51  ;;  %v3728_v63 = vand.u32 4294901760, %v131_v23  ;;  %v1788_v5 = vand.u32 4294901760, %v1787_v40 }
 0x164   :  { %2568 = vmatpush3.msra.mxu1 %v4238_v53  ;;  %2523 = vmatprep.subr.mxu0 %v4277_v19  ;;  %v1766_v53 = vsub.f32 %v3704_v55, %v3717_v37  ;;  %v3786_v19 = vand.u32 4294901760, %v3777_v57 }
 0x165   :  { %1620 = vmatmul.mubr.f32.vlgmr.msra.gmra.mxu1 %v4278_v29  ;;  %2524 = vmatpush3.msra.mxu0 %v4279_v42  ;;  %v1753_v45 = vand.u32 4294901760, %v1752_v13  ;;  %v1760_v47 = vand.u32 4294901760, %v1759_v41  ;;  %v3734_v32 = vsub.f32 %v131_v23, %v3728_v63  ;;  %v3792_v42 = vsub.f32 %v126_v34, %v3780_v58 }
 0x166   :  { %1625 = vmatprep.mubr.f32.mxu1 %v4280_v18  ;;  %2525 = vmatprep.subr.mxu0 %v4281_v43  ;;  %v1767_v2 = vand.u32 4294901760, %v1766_v53  ;;  %4296 = vst [vmem:[#allocation31_spill] sm:$0xff] %v3786_v19  ;;  %v1795_v43 = vand.u32 4294901760, %v1794_v9  ;;  %v3827_v41 = vand.u32 4294901760, %v122_v46 }
 0x167   :  { %2526 = vmatpush3.msra.mxu0 %v4282_v39  ;;  %2718 = vmatprep.subr.mxu1 %v1746_v49  ;;  %v3744_v48 = vand.u32 4294901760, %v3734_v32  ;;  %v1801_v39 = vsub.f32 %v3777_v57, %v3786_v19 }
 0x168   :  { %2527 = vmatprep.subr.mxu0 %v4283_v30  ;;  %2719 = vmatpush3.msra.mxu1 %v1746_v49 }
 0x169   :  { %1627 = vmatmul.mubr.f32.gmra.mxu1 %v4284_v3  ;;  %2528 = vmatpush3.msra.mxu0 %v4285_v56  ;;  %4292 = vst [vmem:[#allocation26_spill] sm:$0xff] %v3744_v48  ;;  %v1773_v11 = vsub.f32 %v3734_v32, %v3744_v48  ;;  %v3804_v56 = vand.u32 4294901760, %v3792_v42 }
 0x16a   :  { %2529 = vmatprep.subr.mxu0 %v4286_v6  ;;  %2720 = vmatprep.subr.mxu1 %v1753_v45  ;;  %v123_v6 = vld [vmem:[#allocation8 + $0x18] sm:$0xff] }
 0x16b   :  { %2530 = vmatpush3.msra.mxu0 %v4287_v52  ;;  %2721 = vmatpush3.msra.mxu1 %v1753_v45  ;;  %v1774_v26 = vand.u32 4294901760, %v1773_v11  ;;  %4297 = vst [vmem:[#allocation21_spill] sm:$0xff] %v3804_v56  ;;  %v1802_v52 = vand.u32 4294901760, %v1801_v39  ;;  %v3813_v36 = vand.u32 4294901760, %v123_v6  ;;  %v1808_v38 = vsub.f32 %v3792_v42, %v3804_v56  ;;  %v120_v11 = vld [vmem:[#allocation8] sm:$0xff] }
 0x16c   :  { %1509 = vmatmul.mubr.f32.vlgmr.msra.gmra.mxu0 %v4278_v29  ;;  %2683 = vmatprep.subr.mxu0 %v3681_v61  ;;  %v3788_v29 = vand.u32 4294901760, %v125_v59  ;;  %v3848_v34 = vand.u32 4294901760, %v120_v11 }
 0x16d   :  { %1514 = vmatprep.mubr.f32.mxu0 %v4280_v18  ;;  %2684 = vmatpush3.msra.mxu0 %v3681_v61  ;;  %v124_v18 = vld [vmem:[#allocation8 + $0x20] sm:$0xff]  ;;  %v3825_v13 = vsub.f32 %v123_v6, %v3813_v36  ;;  %v1809_v53 = vand.u32 4294901760, %v1808_v38 }
 0x16e   :  { %2685 = vmatprep.subr.mxu0 %v3686_v33  ;;  %2722 = vmatprep.subr.mxu1 %v1760_v47  ;;  %v3798_v30 = vsub.f32 %v125_v59, %v3788_v29 }
 0x16f   :  { %2686 = vmatpush3.msra.mxu0 %v3686_v33  ;;  %2723 = vmatpush3.msra.mxu1 %v1760_v47  ;;  %v3834_v62 = vand.u32 4294901760, %v3825_v13 }
 0x170   :  { %1516 = vmatmul.mubr.f32.gmra.mxu0 %v4284_v3  ;;  %2687 = vmatprep.subr.mxu0 %v3688_v28  ;;  %v3800_v3 = vand.u32 4294901760, %v124_v18  ;;  %v3808_v24 = vand.u32 4294901760, %v3798_v30 }
 0x171   :  { %2688 = vmatpush3.msra.mxu0 %v3688_v28  ;;  %2724 = vmatprep.subr.mxu1 %v1767_v2  ;;  %4300 = vst [vmem:[#allocation36_spill] sm:$0xff] %v3834_v62  ;;  %v1829_v16 = vsub.f32 %v3825_v13, %v3834_v62 }
 0x172   :  { %2689 = vmatprep.subr.mxu0 %v3690_v15  ;;  %2725 = vmatpush3.msra.mxu1 %v1767_v2  ;;  %4298 = vst [vmem:[#allocation33_spill] sm:$0xff] %v3808_v24  ;;  %v3811_v31 = vsub.f32 %v124_v18, %v3800_v3  ;;  %v1815_v23 = vsub.f32 %v3798_v30, %v3808_v24 }
 0x173   :  { %2690 = vmatpush3.msra.mxu0 %v3690_v15  ;;  %2726 = vmatprep.subr.mxu1 %v1774_v26  ;;  %v3837_v2 = vsub.f32 %v122_v46, %v3827_v41  ;;  %v1830_v40 = vand.u32 4294901760, %v1829_v16 }
 0x174   :  { %2691 = vmatprep.subr.mxu0 %v3728_v63  ;;  %2727 = vmatpush3.msra.mxu1 %v1774_v26  ;;  %v3822_v49 = vand.u32 4294901760, %v3811_v31  ;;  %v1816_v45 = vand.u32 4294901760, %v1815_v23 }
 0x175   :  { %2692 = vmatpush3.msra.mxu0 %v3728_v63  ;;  %2728 = vmatprep.subr.mxu1 %v1781_v35  ;;  %4301 = vst [vmem:[#allocation24_spill] sm:$0xff] %v3837_v2  ;;  %v3846_v26 = vand.u32 4294901760, %v3837_v2 }
 0x176   :  { %2693 = vmatprep.subr.mxu0 %v3731_v60  ;;  %2729 = vmatpush3.msra.mxu1 %v1781_v35  ;;  %4299 = vst [vmem:[#allocation22_spill] sm:$0xff] %v3822_v49  ;;  %v1822_v47 = vsub.f32 %v3811_v31, %v3822_v49  ;;  %v3852_v35 = vsub.f32 %v121_v27, %v3840_v50 }
 0x177   :  { %2694 = vmatpush3.msra.mxu0 %v3731_v60  ;;  %2730 = vmatprep.subr.mxu1 %v1788_v5  ;;  %4302 = vst [vmem:[#allocation38_spill] sm:$0xff] %v3846_v26  ;;  %v1836_v59 = vsub.f32 %v3837_v2, %v3846_v26 }
 0x178   :  { %2695 = vmatprep.subr.mxu0 %v3740_v8  ;;  %2731 = vmatpush3.msra.mxu1 %v1788_v5  ;;  %v1823_v12 = vand.u32 4294901760, %v1822_v47  ;;  %4303 = vst [vmem:[#allocation27_spill] sm:$0xff] %v3852_v35  ;;  %v3858_v5 = vsub.f32 %v120_v11, %v3848_v34  ;;  %v3862_v9 = vand.u32 4294901760, %v3852_v35 }
 0x179   :  { %2696 = vmatpush3.msra.mxu0 %v3740_v8  ;;  %2732 = vmatprep.subr.mxu1 %v1795_v43  ;;  %v1837_v18 = vand.u32 4294901760, %v1836_v59 }
 0x17a   :  { %2697 = vmatprep.subr.mxu0 %v3753_v7  ;;  %2733 = vmatpush3.msra.mxu1 %v1795_v43  ;;  %4304 = vst [vmem:[#allocation39_spill] sm:$0xff] %v3858_v5  ;;  %4305 = vst [vmem:[#allocation29_spill] sm:$0xff] %v3862_v9  ;;  %v3866_v43 = vand.u32 4294901760, %v3858_v5  ;;  %v1843_v39 = vsub.f32 %v3852_v35, %v3862_v9 }
 0x17b   :  { %2698 = vmatpush3.msra.mxu0 %v3753_v7  ;;  %2734 = vmatprep.subr.mxu1 %v1802_v52 }
 0x17c   :  { %2699 = vmatprep.subr.mxu0 %v3767_v22  ;;  %2735 = vmatpush3.msra.mxu1 %v1802_v52  ;;  %4306 = vst [vmem:[#allocation41_spill] sm:$0xff] %v3866_v43  ;;  %v1850_v6 = vsub.f32 %v3858_v5, %v3866_v43  ;;  %v1844_v52 = vand.u32 4294901760, %v1843_v39 }
 0x17d   :  { %2700 = vmatpush3.msra.mxu0 %v3767_v22  ;;  %2736 = vmatprep.subr.mxu1 %v1809_v53 }
 0x17e   :  { %2701 = vmatprep.subr.mxu0 %v3780_v58  ;;  %2737 = vmatpush3.msra.mxu1 %v1809_v53  ;;  %v1851_v38 = vand.u32 4294901760, %v1850_v6 }
 0x17f   :  { %2702 = vmatpush3.msra.mxu0 %v3780_v58  ;;  %2738 = vmatprep.subr.mxu1 %v1816_v45 }
 0x180   :  { %2703 = vmatprep.subr.mxu0 %v3788_v29  ;;  %2739 = vmatpush3.msra.mxu1 %v1816_v45 }
 0x181   :  { %2704 = vmatpush3.msra.mxu0 %v3788_v29  ;;  %2740 = vmatprep.subr.mxu1 %v1823_v12 }
 0x182   :  { %2705 = vmatprep.subr.mxu0 %v3800_v3  ;;  %2741 = vmatpush3.msra.mxu1 %v1823_v12 }
 0x183   :  { %2706 = vmatpush3.msra.mxu0 %v3800_v3  ;;  %2742 = vmatprep.subr.mxu1 %v1830_v40 }
 0x184   :  { %2707 = vmatprep.subr.mxu0 %v3813_v36  ;;  %2743 = vmatpush3.msra.mxu1 %v1830_v40 }
 0x185   :  { %2708 = vmatpush3.msra.mxu0 %v3813_v36  ;;  %2744 = vmatprep.subr.mxu1 %v1837_v18 }
 0x186   :  { %2709 = vmatprep.subr.mxu0 %v3827_v41  ;;  %2745 = vmatpush3.msra.mxu1 %v1837_v18 }
 0x187   :  { %2710 = vmatpush3.msra.mxu0 %v3827_v41  ;;  %2746 = vmatprep.subr.mxu1 %v1844_v52 }
 0x188   :  { %2711 = vmatprep.subr.mxu0 %v3840_v50  ;;  %2747 = vmatpush3.msra.mxu1 %v1844_v52  ;;  %v2345_v52 = vld [vmem:[%s4034_s4] ss:$0 sm:$0xff] }
 0x189   :  { %2712 = vmatpush3.msra.mxu0 %v3840_v50  ;;  %2748 = vmatprep.subr.mxu1 %v1851_v38 }
 0x18a   :  { %2713 = vmatprep.subr.mxu0 %v3848_v34  ;;  %2749 = vmatpush3.msra.mxu1 %v1851_v38 }
 0x18b   :  { %2714 = vmatpush3.msra.mxu0 %v3848_v34  ;;  %2788 = vmatprep.subr.mxu1 %v3681_v61 }
 0x18c   :  { %2753 = vmatprep.subr.mxu0 %v3684_v25 }
 0x1df   :  { %v2417_v46 = vpop.f32.mrf.mxu1 }
 0x1e1   :  { %v2418_v23 = vpop.f32.mrf.mxu1 }
 0x1e2   :  { %v2419_v49 = vadd.f32 %v2418_v23, %v2417_v46 }
 0x1e3   :  { %v2420_v27 = vpop.f32.mrf.mxu1 }
 0x1e5   :  { %v2421_v47 = vpop.f32.mrf.mxu1 }
 0x1e6   :  { %v2422_v1 = vadd.f32 %v2421_v47, %v2420_v27 }
 0x1e7   :  { %v2379_v53 = vpop.f32.mrf.mxu0 }
 0x1e9   :  { %v2380_v45 = vpop.f32.mrf.mxu0 }
 0x1ea   :  { %v2381_v6 = vadd.f32 %v2380_v45, %v2379_v53 }
 0x1ec   :  { %v2382_v11 = vpop.f32.mrf.mxu0  ;;  %v823_v9 = vadd.f32 %v2381_v6, %v2345_v52 }
 0x1ee   :  { %v2383_v16 = vpop.f32.mrf.mxu0  ;;  %v1070_v54 = vadd.f32 %v2419_v49, %v823_v9 }
 0x1ef   :  { %v2384_v26 = vadd.f32 %v2383_v16, %v2382_v11 }
 0x1f1   :  { %v838_v19 = vadd.f32 %v2384_v26, %v2345_v52 }
 0x1f3   :  { %v1077_v45 = vadd.f32 %v2422_v1, %v838_v19 }
 0x201   :  { %v2493_v12 = vpop.f32.mrf.mxu1 }
 0x203   :  { %v2494_v40 = vpop.f32.mrf.mxu1 }
 0x204   :  { %v2495_v53 = vadd.f32 %v2494_v40, %v2493_v12 }
 0x206   :  { %v2496_v39 = vpop.f32.mrf.mxu1 }
 0x208   :  { %v2497_v38 = vpop.f32.mrf.mxu1 }
 0x209   :  { %v2498_v11 = vadd.f32 %v2497_v38, %v2496_v39 }
 0x20a   :  { %v2455_v59 = vpop.f32.mrf.mxu0 }
 0x20c   :  { %v2456_v18 = vpop.f32.mrf.mxu0 }
 0x20d   :  { %v2457_v24 = vadd.f32 %v2456_v18, %v2455_v59 }
 0x20f   :  { %v2458_v43 = vpop.f32.mrf.mxu0  ;;  %v1215_v48 = vadd.f32 %v2457_v24, %v1070_v54 }
 0x211   :  { %v2459_v56 = vpop.f32.mrf.mxu0  ;;  %v1332_v35 = vadd.f32 %v2495_v53, %v1215_v48 }
 0x212   :  { %v2460_v37 = vadd.f32 %v2459_v56, %v2458_v43 }
 0x214   :  { %v1224_v5 = vadd.f32 %v2460_v37, %v1077_v45 }
 0x216   :  { %v1343_v49 = vadd.f32 %v2498_v11, %v1224_v5 }
 0x225   :  { %v2569_v62 = vpop.f32.mrf.mxu1 }
 0x227   :  { %v2570_v17 = vpop.f32.mrf.mxu1 }
 0x228   :  { %v2571_v16 = vadd.f32 %v2570_v17, %v2569_v62 }
 0x229   :  { %v2572_v10 = vpop.f32.mrf.mxu1 }
 0x22b   :  { %v2573_v23 = vpop.f32.mrf.mxu1 }
 0x22c   :  { %v2531_v51 = vpop.f32.mrf.mxu0  ;;  %v2574_v27 = vadd.f32 %v2573_v23, %v2572_v10 }
 0x22e   :  { %v2532_v20 = vpop.f32.mrf.mxu0 }
 0x22f   :  { %v2533_v2 = vadd.f32 %v2532_v20, %v2531_v51 }
 0x230   :  { %v2534_v6 = vpop.f32.mrf.mxu0 }
 0x231   :  { %v1511_v46 = vadd.f32 %v2533_v2, %v1332_v35 }
 0x232   :  { %v2535_v59 = vpop.f32.mrf.mxu0 }
 0x233   :  { %v1622_v26 = vadd.f32 %v2571_v16, %v1511_v46  ;;  %v2536_v9 = vadd.f32 %v2535_v59, %v2534_v6 }
 0x235   :  { %v1632_v54 = vmax.f32 %v1622_v26, 0.0  ;;  %v1518_v56 = vadd.f32 %v2536_v9, %v1343_v49 }
 0x237   :  { %v3878_v24 = vand.u32 4294901760, %v1632_v54  ;;  %v1629_v1 = vadd.f32 %v2574_v27, %v1518_v56 }
 0x239   :  { %v1722_v19 = vsub.f32 %v1632_v54, %v3878_v24  ;;  %v1633_v37 = vmax.f32 %v1629_v1, 0.0  ;;  %2750 = vmatprep.mubr.f32.mxu1 %v3878_v24 }
 0x23b   :  { %v3882_v20 = vand.u32 4294901760, %v1633_v37  ;;  %v1723_v51 = vand.u32 4294901760, %v1722_v19 }
 0x23d   :  { %v3885_v48 = vsub.f32 %v1633_v37, %v3882_v20  ;;  %2751 = vmatmul.mubr.f32.vlgmr.msra.gmra.mxu1 %v3882_v20  ;;  %v1724_v17 = vsub.f32 %v1722_v19, %v1723_v51 }
 0x23e   :  { %2789 = vmatpush3.msra.mxu1 %v3681_v61  ;;  %2820 = vmatprep.mubr.f32.mxu1 %v1723_v51 }
 0x23f   :  { %v1733_v10 = vand.u32 4294901760, %v3885_v48  ;;  %2790 = vmatprep.subr.mxu1 %v3686_v33  ;;  %v1725_v62 = vand.u32 4294901760, %v1724_v17 }
 0x240   :  { %2791 = vmatpush3.msra.mxu1 %v3686_v33 }
 0x241   :  { %v1734_v2 = vsub.f32 %v3885_v48, %v1733_v10  ;;  %2792 = vmatprep.subr.mxu1 %v3688_v28  ;;  %2715 = vmatprep.mubr.f32.mxu0 %v1725_v62 }
 0x242   :  { %2793 = vmatpush3.msra.mxu1 %v3688_v28 }
 0x243   :  { %2794 = vmatprep.subr.mxu1 %v3690_v15  ;;  %v1735_v35 = vand.u32 4294901760, %v1734_v2 }
 0x244   :  { %2795 = vmatpush3.msra.mxu1 %v3690_v15 }
 0x245   :  { %2796 = vmatprep.subr.mxu1 %v3728_v63  ;;  %2716 = vmatmul.mubr.f32.vlgmr.msra.gmra.mxu0 %v1735_v35 }
 0x246   :  { %2754 = vmatpush3.msra.mxu0 %v3684_v25  ;;  %2797 = vmatpush3.msra.mxu1 %v3728_v63  ;;  %v4307_v25 = vld [vmem:[#allocation24_spill] sm:$0xff] }
 0x247   :  { %2755 = vmatprep.subr.mxu0 %v3698_v14  ;;  %2785 = vmatprep.mubr.f32.mxu0 %v1722_v19 }
 0x248   :  { %2798 = vmatprep.subr.mxu1 %v3731_v60  ;;  %2756 = vmatpush3.msra.mxu0 %v3698_v14  ;;  %v4308_v14 = vld [vmem:[#allocation27_spill] sm:$0xff] }
 0x249   :  { %2799 = vmatpush3.msra.mxu1 %v3731_v60  ;;  %2757 = vmatprep.subr.mxu0 %v3701_v44 }
 0x24a   :  { %2800 = vmatprep.subr.mxu1 %v3740_v8  ;;  %2758 = vmatpush3.msra.mxu0 %v3701_v44  ;;  %v4309_v44 = vld [vmem:[#allocation39_spill] sm:$0xff] }
 0x24b   :  { %2801 = vmatpush3.msra.mxu1 %v3740_v8  ;;  %2759 = vmatprep.subr.mxu0 %v3704_v55 }
 0x24c   :  { %2802 = vmatprep.subr.mxu1 %v3753_v7  ;;  %2760 = vmatpush3.msra.mxu0 %v3704_v55  ;;  %v4314_v55 = vld [vmem:[#allocation26_spill] sm:$0xff] }
 0x24d   :  { %2803 = vmatpush3.msra.mxu1 %v3753_v7  ;;  %2761 = vmatprep.subr.mxu0 %v3734_v32 }
 0x24e   :  { %2804 = vmatprep.subr.mxu1 %v3767_v22  ;;  %2762 = vmatpush3.msra.mxu0 %v3734_v32  ;;  %v4317_v32 = vld [vmem:[#allocation20_spill] sm:$0xff] }
 0x24f   :  { %2805 = vmatpush3.msra.mxu1 %v3767_v22  ;;  %2763 = vmatprep.subr.mxu0 %v3738_v4 }
 0x250   :  { %2806 = vmatprep.subr.mxu1 %v3780_v58  ;;  %2764 = vmatpush3.msra.mxu0 %v3738_v4  ;;  %v4318_v4 = vld [vmem:[#allocation31_spill] sm:$0xff] }
 0x251   :  { %2807 = vmatpush3.msra.mxu1 %v3780_v58  ;;  %2765 = vmatprep.subr.mxu0 %v3751_v0 }
 0x252   :  { %2808 = vmatprep.subr.mxu1 %v3788_v29  ;;  %2766 = vmatpush3.msra.mxu0 %v3751_v0  ;;  %v4320_v0 = vld [vmem:[#allocation33_spill] sm:$0xff] }
 0x253   :  { %2809 = vmatpush3.msra.mxu1 %v3788_v29  ;;  %2767 = vmatprep.subr.mxu0 %v3765_v21 }
 0x254   :  { %2810 = vmatprep.subr.mxu1 %v3800_v3  ;;  %2768 = vmatpush3.msra.mxu0 %v3765_v21  ;;  %v4322_v21 = vld [vmem:[#allocation36_spill] sm:$0xff] }
 0x255   :  { %2811 = vmatpush3.msra.mxu1 %v3800_v3  ;;  %2769 = vmatprep.subr.mxu0 %v3777_v57 }
 0x256   :  { %2812 = vmatprep.subr.mxu1 %v3813_v36  ;;  %2770 = vmatpush3.msra.mxu0 %v3777_v57  ;;  %v4324_v57 = vld [vmem:[#allocation29_spill] sm:$0xff] }
 0x257   :  { %2813 = vmatpush3.msra.mxu1 %v3813_v36  ;;  %2771 = vmatprep.subr.mxu0 %v3792_v42 }
 0x258   :  { %2814 = vmatprep.subr.mxu1 %v3827_v41  ;;  %2772 = vmatpush3.msra.mxu0 %v3792_v42  ;;  %v2346_v42 = vld [vmem:[%s4036_s6] ss:$0 sm:$0xff]  ;;  %s3020_s6 = smov [#allocation10]  }
 0x259   :  { %2815 = vmatpush3.msra.mxu1 %v3827_v41  ;;  %2773 = vmatprep.subr.mxu0 %v3798_v30  ;;  %s2331_s25 = sshll.u32 %s3020_s6, 4  ;;  %s2332_s25 = int_to_ptr.vmem [resolvable:$true] %s2331_s25 }
 0x25a   :  { %2816 = vmatprep.subr.mxu1 %v3840_v50  ;;  %2774 = vmatpush3.msra.mxu0 %v3798_v30  ;;  %s2983_s26 = scalar_lea.vmem %s2332_s25, 256  ;;  %p2988_p7 = scmp.lt.s32.totalorder %s2332_s25, %s2332_s25 }
 0x25b   :  { %2817 = vmatpush3.msra.mxu1 %v3840_v50  ;;  %2775 = vmatprep.subr.mxu0 %v3811_v31  ;;  %p2984_p6 = scmp.ne.s32.totalorder %s2332_s25, %s2983_s26  ;;  %p2989_p8 = scmp.lt.s32.totalorder %s2983_s26, %s2983_s26 }
 0x25c   :  { %2818 = vmatprep.subr.mxu1 %v3848_v34  ;;  %2776 = vmatpush3.msra.mxu0 %v3811_v31 }
 0x25d   :  { %2819 = vmatpush3.msra.mxu1 %v3848_v34  ;;  %2777 = vmatprep.subr.mxu0 %v3825_v13  ;;  %p2990_p9 = por %p2989_p8, %p2988_p7 }
 0x25e   :  { %2821 = vmatmul.mubr.f32.vlgmr.msra.gmra.mxu1 %v1733_v10  ;;  %2858 = vmatprep.subr.mxu1 %v3681_v61 }
 0x25f   :  { %2778 = vmatpush3.msra.mxu0 %v3825_v13  ;;  %2859 = vmatpush3.msra.mxu1 %v3681_v61  ;;  %v4310_v61 = vld [vmem:[#allocation23_spill] sm:$0xff]  ;;  %p2991_p10 = pnand %p2990_p9, %p2984_p6 }
 0x260   :  { %2890 = vmatprep.mubr.f32.mxu1 %v3878_v24  ;;  %2779 = vmatprep.subr.mxu0 %v4307_v25 }
 0x261   :  { %2860 = vmatprep.subr.mxu1 %v3686_v33  ;;  %2780 = vmatpush3.msra.mxu0 %v4307_v25 }
 0x262   :  { %2861 = vmatpush3.msra.mxu1 %v3686_v33  ;;  %2781 = vmatprep.subr.mxu0 %v4308_v14  ;;  %v4311_v33 = vld [vmem:[#allocation17_spill] sm:$0xff] }
 0x263   :  { %2862 = vmatprep.subr.mxu1 %v3688_v28  ;;  %2782 = vmatpush3.msra.mxu0 %v4308_v14 }
 0x264   :  { %2863 = vmatpush3.msra.mxu1 %v3688_v28  ;;  %2783 = vmatprep.subr.mxu0 %v4309_v44  ;;  %v4312_v28 = vld [vmem:[#allocation25_spill] sm:$0xff] }
 0x265   :  { %2864 = vmatprep.subr.mxu1 %v3690_v15  ;;  %2784 = vmatpush3.msra.mxu0 %v4309_v44 }
 0x266   :  { %2865 = vmatpush3.msra.mxu1 %v3690_v15  ;;  %2786 = vmatmul.mubr.f32.vlgmr.msra.gmra.mxu0 %v3885_v48  ;;  %v4313_v15 = vld [vmem:[#allocation18_spill] sm:$0xff] }
 0x267   :  { %2823 = vmatprep.subr.mxu0 %v4310_v61  ;;  %2866 = vmatprep.subr.mxu1 %v3728_v63 }
 0x268   :  { %2824 = vmatpush3.msra.mxu0 %v4310_v61  ;;  %2855 = vmatprep.mubr.f32.mxu0 %v3878_v24 }
 0x269   :  { %2867 = vmatpush3.msra.mxu1 %v3728_v63  ;;  %2825 = vmatprep.subr.mxu0 %v4311_v33  ;;  %v4315_v63 = vld [vmem:[#allocation19_spill] sm:$0xff] }
 0x26a   :  { %2868 = vmatprep.subr.mxu1 %v3731_v60  ;;  %2826 = vmatpush3.msra.mxu0 %v4311_v33 }
 0x26b   :  { %2869 = vmatpush3.msra.mxu1 %v3731_v60  ;;  %2827 = vmatprep.subr.mxu0 %v4312_v28  ;;  %v4316_v60 = vld [vmem:[#allocation28_spill] sm:$0xff] }
 0x26c   :  { %2870 = vmatprep.subr.mxu1 %v3740_v8  ;;  %2828 = vmatpush3.msra.mxu0 %v4312_v28 }
 0x26d   :  { %2871 = vmatpush3.msra.mxu1 %v3740_v8  ;;  %2829 = vmatprep.subr.mxu0 %v4313_v15  ;;  %v4319_v8 = vld [vmem:[#allocation21_spill] sm:$0xff] }
 0x26e   :  { %2872 = vmatprep.subr.mxu1 %v3753_v7  ;;  %2830 = vmatpush3.msra.mxu0 %v4313_v15 }
 0x26f   :  { %2873 = vmatpush3.msra.mxu1 %v3753_v7  ;;  %2831 = vmatprep.subr.mxu0 %v4314_v55  ;;  %v4321_v7 = vld [vmem:[#allocation22_spill] sm:$0xff] }
 0x270   :  { %2874 = vmatprep.subr.mxu1 %v3767_v22  ;;  %2832 = vmatpush3.msra.mxu0 %v4314_v55 }
 0x271   :  { %2875 = vmatpush3.msra.mxu1 %v3767_v22  ;;  %2833 = vmatprep.subr.mxu0 %v4315_v63  ;;  %v4323_v22 = vld [vmem:[#allocation38_spill] sm:$0xff] }
 0x272   :  { %2876 = vmatprep.subr.mxu1 %v3780_v58  ;;  %2834 = vmatpush3.msra.mxu0 %v4315_v63 }
 0x273   :  { %2877 = vmatpush3.msra.mxu1 %v3780_v58  ;;  %2835 = vmatprep.subr.mxu0 %v4316_v60  ;;  %v4325_v58 = vld [vmem:[#allocation41_spill] sm:$0xff] }
 0x274   :  { %2878 = vmatprep.subr.mxu1 %v3788_v29  ;;  %2836 = vmatpush3.msra.mxu0 %v4316_v60 }
 0x275   :  { %2879 = vmatpush3.msra.mxu1 %v3788_v29  ;;  %2837 = vmatprep.subr.mxu0 %v4317_v32 }
 0x276   :  { %2880 = vmatprep.subr.mxu1 %v3800_v3  ;;  %2838 = vmatpush3.msra.mxu0 %v4317_v32 }
 0x277   :  { %2881 = vmatpush3.msra.mxu1 %v3800_v3  ;;  %2839 = vmatprep.subr.mxu0 %v4318_v4 }
 0x278   :  { %2882 = vmatprep.subr.mxu1 %v3813_v36  ;;  %2840 = vmatpush3.msra.mxu0 %v4318_v4 }
 0x279   :  { %2883 = vmatpush3.msra.mxu1 %v3813_v36  ;;  %2841 = vmatprep.subr.mxu0 %v4319_v8 }
 0x27a   :  { %2884 = vmatprep.subr.mxu1 %v3827_v41  ;;  %2842 = vmatpush3.msra.mxu0 %v4319_v8 }
 0x27b   :  { %2885 = vmatpush3.msra.mxu1 %v3827_v41  ;;  %2843 = vmatprep.subr.mxu0 %v4320_v0 }
 0x27c   :  { %2886 = vmatprep.subr.mxu1 %v3840_v50  ;;  %2844 = vmatpush3.msra.mxu0 %v4320_v0 }
 0x27d   :  { %2887 = vmatpush3.msra.mxu1 %v3840_v50  ;;  %2845 = vmatprep.subr.mxu0 %v4321_v7 }
 0x27e   :  { %2888 = vmatprep.subr.mxu1 %v3848_v34  ;;  %2846 = vmatpush3.msra.mxu0 %v4321_v7 }
 0x27f   :  { %2889 = vmatpush3.msra.mxu1 %v3848_v34  ;;  %2847 = vmatprep.subr.mxu0 %v4322_v21 }
 0x280   :  { %2891 = vmatmul.mubr.f32.vlgmr.msra.gmra.mxu1 %v3882_v20  ;;  %2848 = vmatpush3.msra.mxu0 %v4322_v21 }
 0x281   :  { %2849 = vmatprep.subr.mxu0 %v4323_v22 }
 0x282   :  { %2850 = vmatpush3.msra.mxu0 %v4323_v22 }
 0x283   :  { %2851 = vmatprep.subr.mxu0 %v4324_v57 }
 0x284   :  { %2852 = vmatpush3.msra.mxu0 %v4324_v57 }
 0x285   :  { %2853 = vmatprep.subr.mxu0 %v4325_v58 }
 0x286   :  { %2854 = vmatpush3.msra.mxu0 %v4325_v58 }
 0x287   :  { %2856 = vmatmul.mubr.f32.vlgmr.msra.gmra.mxu0 %v3882_v20 }
 0x2fd   :  { %v2752_v30 = vpop.f32.mrf.mxu1 }
 0x2ff   :  { %v1888_v41 = vpop.f32.mrf.mxu1 }
 0x305   :  { %v2717_v29 = vpop.f32.mrf.mxu0 }
 0x306   :  { %v1738_v31 = vadd.f32 %v2717_v29, %v2346_v42 }
 0x307   :  { %v1727_v3 = vpop.f32.mrf.mxu0 }
 0x308   :  { %v1728_v13 = vadd.f32 %v2346_v42, %v1727_v3  ;;  %v1895_v50 = vadd.f32 %v2752_v30, %v1738_v31 }
 0x30a   :  { %v1889_v47 = vadd.f32 %v1888_v41, %v1728_v13 }
 0x31e   :  { %v2822_v34 = vpop.f32.mrf.mxu1 }
 0x320   :  { %v2094_v40 = vpop.f32.mrf.mxu1 }
 0x326   :  { %v2787_v36 = vpop.f32.mrf.mxu0 }
 0x327   :  { %v2006_v43 = vadd.f32 %v2787_v36, %v1895_v50 }
 0x328   :  { %v1998_v5 = vpop.f32.mrf.mxu0 }
 0x329   :  { %v1999_v12 = vadd.f32 %v1998_v5, %v1889_v47  ;;  %v2103_v39 = vadd.f32 %v2822_v34, %v2006_v43 }
 0x32b   :  { %v2095_v53 = vadd.f32 %v2094_v40, %v1999_v12 }
 0x340   :  { %v2892_v18 = vpop.f32.mrf.mxu1 }
 0x342   :  { %v2314_v16 = vpop.f32.mrf.mxu1 }
 0x347   :  { %v2857_v52 = vpop.f32.mrf.mxu0 }
 0x348   :  { %v2228_v38 = vadd.f32 %v2857_v52, %v2103_v39 }
 0x349   :  { %v2221_v45 = vpop.f32.mrf.mxu0 }
 0x34a   :  { %v2321_v6 = vadd.f32 %v2892_v18, %v2228_v38  ;;  %v2222_v11 = vadd.f32 %v2221_v45, %v2095_v53 }
 0x34c   :  { %2325 = vst [vmem:[#allocation10 + $0x8] sm:$0xff] %v2321_v6  ;;  %v2315_v46 = vadd.f32 %v2314_v16, %v2222_v11 }
 0x34e   :  { %2324 = vst [vmem:[#allocation10] sm:$0xff] %v2315_v46 }
 0x34f   :  { %2994 = shalt.err (!%p2991_p10)
}
 0x350   :  { %2337 = dma.vmem_to_hbm [thread:$0]  %s2332_s25, 256, %s4037_s7, [#allocation4], %s3015_s11, %s3015_s11, %s3016_s12  }
 0x351   :  { %3009 = dma.done.wait [#allocation4], 256  }
 0x352   :  { %3010 = vsyncadd [#allocation4], 4294967040 }
 0x353   :  { %2341 = vsyncpa [#allocation3], 1 }
 0x354   :  { %2342 = vsyncpa [#allocation6], 1 }
 0x355   :  { %2343 = vsyncpa [#allocation9], 1 }
 0x356   :  { %2344 = vsyncpa [#allocation4], 1 }

</bundles_post_ra>
